<compile_context>
chip_gen: v7x
topology: tpu7x:2x2x1
jax: 0.10.0
libtpu: 0.0.40
codegen_flags: <defaults>
</compile_context>

<pallas_src>
import functools

import jax
import jax.numpy as jnp
from jax.experimental import pallas as pl
from jax.experimental.pallas import tpu as pltpu

EPS = 1e-5
_VMEM_LIMIT = 32 * 1024 * 1024  # > v5e's 16 MiB default scope, <= physical on all gens


def _pick_row_tile(H):
    """Largest even divisor of H (<=16) that still gives >=2 row blocks when possible."""
    for t in (16, 8, 4, 2):
        if H % t == 0 and t < H:
            return t
    return H


def _conv_stats_kernel(Ht, W, C, cur_ref, nxt_ref, w_ref, y_ref, stats_ref, col_ref):
    """Pass 1: 3x3 conv for one (image, row-block) plus per-block BN partial stats.

    cur_ref:   (1, Ht,  W+2, C) bf16 -- padded rows [i*Ht, i*Ht+Ht)
    nxt_ref:   (1, 2,   W+2, C) bf16 -- padded rows [i*Ht+Ht, i*Ht+Ht+2) (halo)
    w_ref:     (9*C, Cout)      bf16 -- taps flattened as (kh*3+kw)*C + cin
    y_ref:     (1, Ht, W, Cout) f32  -- conv output block
    stats_ref: (1, 1, 8, Cout)  f32  -- row 0 = sum, row 1 = sum of squares
    col_ref:   (Ht*W, 9*C)      bf16 -- im2col VMEM scratch
    """
    Cout = y_ref.shape[-1]
    M = Ht * W

    cur = cur_ref[0]      # (Ht, W+2, C)
    nxt = nxt_ref[0]      # (2,  W+2, C)

    for kw in range(3):
        # Sublane-crossing W slice materialized once per kw (3 relayout copies);
        # the kh taps below are cheap outer-dim row slices of it.
        cur_kw = cur[:, kw:kw + W, :]          # (Ht, W, C)
        nxt_kw = nxt[:, kw:kw + W, :]          # (2,  W, C)
        for kh in range(3):
            c0 = (kh * 3 + kw) * C             # lane-aligned column offset (C=256)
            n_cur = Ht - kh                    # output rows fed from `cur`
            col_ref[0:n_cur * W, c0:c0 + C] = (
                cur_kw[kh:, :, :].reshape(n_cur * W, C))
            if kh > 0:                         # remaining rows come from the halo
                col_ref[n_cur * W:M, c0:c0 + C] = (
                    nxt_kw[0:kh, :, :].reshape(kh * W, C))

    # Single K=9*C bf16 MXU matmul per block: no per-tap accumulator traffic.
    y = jnp.dot(col_ref[...], w_ref[...], preferred_element_type=jnp.float32)

    y_ref[...] = y.reshape(1, Ht, W, Cout)

    # Per-block BatchNorm partials (two-phase BN, reduced in the wrapper).
    s = jnp.sum(y, axis=0, keepdims=True)            # (1, Cout)
    sq = jnp.sum(y * y, axis=0, keepdims=True)       # (1, Cout)
    pad = jnp.zeros((6, Cout), jnp.float32)
    stats_ref[...] = jnp.concatenate([s, sq, pad], axis=0).reshape(1, 1, 8, Cout)


def _bn_relu_kernel(y_ref, scale_ref, shift_ref, o_ref):
    """Pass 2: affine BN + ReLU on lane-dense NHWC blocks."""
    o_ref[...] = jnp.maximum(y_ref[...] * scale_ref[...] + shift_ref[...], 0.0)


@jax.jit
def block_of_dmt2(x_nchw, w_oihw, b_conv, gamma, beta):
    """Forward pass of Block_of_DMT2. x_nchw: (N, 256, H, W) f32 -> same shape."""
    del b_conv  # per-channel conv bias cancels exactly under training-mode BatchNorm
    N, C, H, W = x_nchw.shape
    Cout = w_oihw.shape[0]
    assert H % 2 == 0, "row-halo tiling requires an even spatial height"

    Ht = _pick_row_tile(H)
    nb = H // Ht
    Wp = W + 2
    half = Ht // 2

    # bf16 activations; the cast fuses into the transpose + SAME pad.
    x_nhwc = jnp.transpose(x_nchw, (0, 2, 3, 1)).astype(jnp.bfloat16)
    x_pad = jnp.pad(x_nhwc, ((0, 0), (1, 1), (1, 1), (0, 0)))        # (N, H+2, W+2, C)

    # (O, I, kH, kW) -> (kh, kw, cin, cout) -> (9*C, Cout), row = (kh*3+kw)*C + cin.
    w_mat = jnp.transpose(w_oihw, (2, 3, 1, 0)).reshape(9 * C, Cout).astype(jnp.bfloat16)

    conv_cost = pl.CostEstimate(
        flops=2 * N * H * W * 9 * C * Cout,
        transcendentals=0,
        bytes_accessed=(N * (H + 2) * Wp * C * 2 + 9 * C * Cout * 2
                        + N * H * W * Cout * 4 + N * nb * 8 * Cout * 4))

    conv_out, stats = pl.pallas_call(
        functools.partial(_conv_stats_kernel, Ht, W, C),
        out_shape=(jax.ShapeDtypeStruct((N, H, W, Cout), jnp.float32),
                   jax.ShapeDtypeStruct((N, nb, 8, Cout), jnp.float32)),
        grid_spec=pltpu.PrefetchScalarGridSpec(
            num_scalar_prefetch=0,
            grid=(N, nb),
            in_specs=[
                pl.BlockSpec((1, Ht, Wp, C), lambda n, i: (n, i, 0, 0)),
                pl.BlockSpec((1, 2, Wp, C), lambda n, i: (n, (i + 1) * half, 0, 0)),
                pl.BlockSpec((9 * C, Cout), lambda n, i: (0, 0)),   # VMEM-resident weights
            ],
            out_specs=[
                pl.BlockSpec((1, Ht, W, Cout), lambda n, i: (n, i, 0, 0)),
                pl.BlockSpec((1, 1, 8, Cout), lambda n, i: (n, i, 0, 0)),
            ],
            scratch_shapes=[pltpu.VMEM((Ht * W, 9 * C), jnp.bfloat16)],
        ),
        compiler_params=pltpu.CompilerParams(
            dimension_semantics=("parallel", "parallel"),
            vmem_limit_bytes=_VMEM_LIMIT),
        cost_estimate=conv_cost,
    )(x_pad, x_pad, w_mat)

    # Two-phase BN, reduction step: tiny per-block partials -> batch mean / biased var.
    cnt = jnp.float32(N * H * W)
    ssum = jnp.sum(stats[:, :, 0, :], axis=(0, 1))
    ssq = jnp.sum(stats[:, :, 1, :], axis=(0, 1))
    mean = ssum / cnt
    var = jnp.maximum(ssq / cnt - mean * mean, 0.0)   # clamp single-pass variance
    scale = gamma * jax.lax.rsqrt(var + EPS)
    shift = beta - mean * scale

    bn_cost = pl.CostEstimate(
        flops=3 * N * H * W * Cout,
        transcendentals=0,
        bytes_accessed=2 * N * H * W * Cout * 4 + 2 * Cout * 4)

    out_nhwc = pl.pallas_call(
        _bn_relu_kernel,
        out_shape=jax.ShapeDtypeStruct((N, H, W, Cout), jnp.float32),
        grid_spec=pltpu.PrefetchScalarGridSpec(
            num_scalar_prefetch=0,
            grid=(N, nb),
            in_specs=[
                pl.BlockSpec((1, Ht, W, Cout), lambda n, i: (n, i, 0, 0)),
                pl.BlockSpec((1, Cout), lambda n, i: (0, 0)),
                pl.BlockSpec((1, Cout), lambda n, i: (0, 0)),
            ],
            out_specs=pl.BlockSpec((1, Ht, W, Cout), lambda n, i: (n, i, 0, 0)),
        ),
        compiler_params=pltpu.CompilerParams(
            dimension_semantics=("parallel", "parallel"),
            vmem_limit_bytes=_VMEM_LIMIT),
        cost_estimate=bn_cost,
    )(conv_out, scale.reshape(1, Cout), shift.reshape(1, Cout))

    return jnp.transpose(out_nhwc, (0, 3, 1, 2))      # back to NCHW at the interface


def reference(x_nchw, w_oihw, b_conv, gamma, beta):
    """Pure-JAX f32 reference of the PyTorch forward (training-mode BN)."""
    x = jnp.transpose(x_nchw, (0, 2, 3, 1))
    w = jnp.transpose(w_oihw, (2, 3, 1, 0))
    y = jax.lax.conv_general_dilated(
        x, w, window_strides=(1, 1), padding="SAME",
        dimension_numbers=("NHWC", "HWIO", "NHWC")) + b_conv
    mean = jnp.mean(y, axis=(0, 1, 2))
    var = jnp.mean((y - mean) ** 2, axis=(0, 1, 2))
    yn = (y - mean) * jax.lax.rsqrt(var + EPS) * gamma + beta
    return jnp.transpose(jnp.maximum(yn, 0.0), (0, 3, 1, 2))


if __name__ == "__main__":
    key = jax.random.PRNGKey(0)
    k_x, k_w, k_b, k_g, k_bt = jax.random.split(key, 5)

    # Module fixes in/out channels at 256; keep batch/spatial small.
    N, C, H, W = 2, 256, 8, 8
    x = jax.random.normal(k_x, (N, C, H, W), jnp.float32)
    w_conv = jax.random.normal(k_w, (C, C, 3, 3), jnp.float32) * 0.05   # (O, I, kH, kW)
    b_conv = jax.random.normal(k_b, (C,), jnp.float32) * 0.1
    gamma = 1.0 + 0.1 * jax.random.normal(k_g, (C,), jnp.float32)
    beta = 0.1 * jax.random.normal(k_bt, (C,), jnp.float32)

    out = jax.block_until_ready(block_of_dmt2(x, w_conv, b_conv, gamma, beta))
    ref = reference(x, w_conv, b_conv, gamma, beta)

    assert out.shape == (N, C, H, W), out.shape
    # bf16 MXU operands with f32 accumulation (and bf16-quantized batch stats) ->
    # slightly looser tolerance vs the pure-f32 reference.
    err = float(jnp.max(jnp.abs(out - ref)))
    assert jnp.allclose(out, ref, atol=3e-2, rtol=1e-2), err
    print("KERNEL_OK")
</pallas_src>

<mosaic_0001>
module attributes {stable_mosaic.version = 11 : i64} {
  func.func @_conv_stats_kernel(%arg0: i32, %arg1: i32, %arg2: memref<1x4x10x256xbf16, #tpu.memory_space<vmem>>, %arg3: memref<1x2x10x256xbf16, #tpu.memory_space<vmem>>, %arg4: memref<2304x256xbf16, #tpu.memory_space<vmem>>, %arg5: memref<1x4x8x256xf32, #tpu.memory_space<vmem>>, %arg6: memref<1x1x8x256xf32, #tpu.memory_space<vmem>>, %arg7: memref<32x2304xbf16, #tpu.memory_space<vmem>>) attributes {dimension_semantics = [#tpu.dimension_semantics<parallel>, #tpu.dimension_semantics<parallel>], iteration_bounds = array<i64: 2, 2>, scalar_prefetch = 0 : i64, scratch_operands = 1 : i64, tpu.core_type = #tpu.core_type<tc>, window_params = [{transform_indices = @transform_0, window_bounds = array<i64: 1, 4, 10, 256>}, {transform_indices = @transform_1, window_bounds = array<i64: 1, 2, 10, 256>}, {pipeline_mode = #tpu.pipeline_mode<synchronous>, transform_indices = @transform_2, window_bounds = array<i64: 2304, 256>}, {transform_indices = @transform_3, window_bounds = array<i64: 1, 4, 8, 256>}, {transform_indices = @transform_4, window_bounds = array<i64: 1, 1, 8, 256>}]} {
    %c0 = arith.constant 0 : index
    %c0_0 = arith.constant 0 : index
    %c0_1 = arith.constant 0 : index
    %c0_2 = arith.constant 0 : index
    %0 = vector.load %arg2[%c0, %c0_0, %c0_1, %c0_2] : memref<1x4x10x256xbf16, #tpu.memory_space<vmem>>, vector<1x4x10x256xbf16>
    %1 = vector.shape_cast %0 : vector<1x4x10x256xbf16> to vector<4x10x256xbf16>
    %c0_3 = arith.constant 0 : index
    %c0_4 = arith.constant 0 : index
    %c0_5 = arith.constant 0 : index
    %c0_6 = arith.constant 0 : index
    %2 = vector.load %arg3[%c0_3, %c0_4, %c0_5, %c0_6] : memref<1x2x10x256xbf16, #tpu.memory_space<vmem>>, vector<1x2x10x256xbf16>
    %3 = vector.shape_cast %2 : vector<1x2x10x256xbf16> to vector<2x10x256xbf16>
    %4 = vector.extract_strided_slice %1 {offsets = [0, 0, 0], sizes = [4, 8, 256], strides = [1, 1, 1]} : vector<4x10x256xbf16> to vector<4x8x256xbf16>
    %5 = vector.extract_strided_slice %3 {offsets = [0, 0, 0], sizes = [2, 8, 256], strides = [1, 1, 1]} : vector<2x10x256xbf16> to vector<2x8x256xbf16>
    %6 = vector.shape_cast %4 : vector<4x8x256xbf16> to vector<32x256xbf16>
    %c0_7 = arith.constant 0 : index
    %c0_8 = arith.constant 0 : index
    %7 = vector.load %arg7[%c0_7, %c0_8] : memref<32x2304xbf16, #tpu.memory_space<vmem>>, vector<32x256xbf16>
    tpu.vector_store %arg7[%c0_7, %c0_8], %6 {strides = array<i32>} : memref<32x2304xbf16, #tpu.memory_space<vmem>>, vector<32x256xbf16>,
    %8 = vector.extract_strided_slice %4 {offsets = [1, 0, 0], sizes = [3, 8, 256], strides = [1, 1, 1]} : vector<4x8x256xbf16> to vector<3x8x256xbf16>
    %9 = vector.shape_cast %8 : vector<3x8x256xbf16> to vector<24x256xbf16>
    %c0_9 = arith.constant 0 : index
    %c768 = arith.constant 768 : index
    %10 = vector.load %arg7[%c0_9, %c768] : memref<32x2304xbf16, #tpu.memory_space<vmem>>, vector<24x256xbf16>
    tpu.vector_store %arg7[%c0_9, %c768], %9 {strides = array<i32>} : memref<32x2304xbf16, #tpu.memory_space<vmem>>, vector<24x256xbf16>,
    %11 = vector.extract_strided_slice %5 {offsets = [0, 0, 0], sizes = [1, 8, 256], strides = [1, 1, 1]} : vector<2x8x256xbf16> to vector<1x8x256xbf16>
    %12 = vector.shape_cast %11 : vector<1x8x256xbf16> to vector<8x256xbf16>
    %c24 = arith.constant 24 : index
    %c768_10 = arith.constant 768 : index
    %13 = vector.load %arg7[%c24, %c768_10] : memref<32x2304xbf16, #tpu.memory_space<vmem>>, vector<8x256xbf16>
    tpu.vector_store %arg7[%c24, %c768_10], %12 {strides = array<i32>} : memref<32x2304xbf16, #tpu.memory_space<vmem>>, vector<8x256xbf16>,
    %14 = vector.extract_strided_slice %4 {offsets = [2, 0, 0], sizes = [2, 8, 256], strides = [1, 1, 1]} : vector<4x8x256xbf16> to vector<2x8x256xbf16>
    %15 = vector.shape_cast %14 : vector<2x8x256xbf16> to vector<16x256xbf16>
    %c0_11 = arith.constant 0 : index
    %c1536 = arith.constant 1536 : index
    %16 = vector.load %arg7[%c0_11, %c1536] : memref<32x2304xbf16, #tpu.memory_space<vmem>>, vector<16x256xbf16>
    tpu.vector_store %arg7[%c0_11, %c1536], %15 {strides = array<i32>} : memref<32x2304xbf16, #tpu.memory_space<vmem>>, vector<16x256xbf16>,
    %17 = vector.shape_cast %5 : vector<2x8x256xbf16> to vector<16x256xbf16>
    %c16 = arith.constant 16 : index
    %c1536_12 = arith.constant 1536 : index
    %18 = vector.load %arg7[%c16, %c1536_12] : memref<32x2304xbf16, #tpu.memory_space<vmem>>, vector<16x256xbf16>
    tpu.vector_store %arg7[%c16, %c1536_12], %17 {strides = array<i32>} : memref<32x2304xbf16, #tpu.memory_space<vmem>>, vector<16x256xbf16>,
    %19 = vector.extract_strided_slice %1 {offsets = [0, 1, 0], sizes = [4, 8, 256], strides = [1, 1, 1]} : vector<4x10x256xbf16> to vector<4x8x256xbf16>
    %20 = vector.extract_strided_slice %3 {offsets = [0, 1, 0], sizes = [2, 8, 256], strides = [1, 1, 1]} : vector<2x10x256xbf16> to vector<2x8x256xbf16>
    %21 = vector.shape_cast %19 : vector<4x8x256xbf16> to vector<32x256xbf16>
    %c0_13 = arith.constant 0 : index
    %c256 = arith.constant 256 : index
    %22 = vector.load %arg7[%c0_13, %c256] : memref<32x2304xbf16, #tpu.memory_space<vmem>>, vector<32x256xbf16>
    tpu.vector_store %arg7[%c0_13, %c256], %21 {strides = array<i32>} : memref<32x2304xbf16, #tpu.memory_space<vmem>>, vector<32x256xbf16>,
    %23 = vector.extract_strided_slice %19 {offsets = [1, 0, 0], sizes = [3, 8, 256], strides = [1, 1, 1]} : vector<4x8x256xbf16> to vector<3x8x256xbf16>
    %24 = vector.shape_cast %23 : vector<3x8x256xbf16> to vector<24x256xbf16>
    %c0_14 = arith.constant 0 : index
    %c1024 = arith.constant 1024 : index
    %25 = vector.load %arg7[%c0_14, %c1024] : memref<32x2304xbf16, #tpu.memory_space<vmem>>, vector<24x256xbf16>
    tpu.vector_store %arg7[%c0_14, %c1024], %24 {strides = array<i32>} : memref<32x2304xbf16, #tpu.memory_space<vmem>>, vector<24x256xbf16>,
    %26 = vector.extract_strided_slice %20 {offsets = [0, 0, 0], sizes = [1, 8, 256], strides = [1, 1, 1]} : vector<2x8x256xbf16> to vector<1x8x256xbf16>
    %27 = vector.shape_cast %26 : vector<1x8x256xbf16> to vector<8x256xbf16>
    %c24_15 = arith.constant 24 : index
    %c1024_16 = arith.constant 1024 : index
    %28 = vector.load %arg7[%c24_15, %c1024_16] : memref<32x2304xbf16, #tpu.memory_space<vmem>>, vector<8x256xbf16>
    tpu.vector_store %arg7[%c24_15, %c1024_16], %27 {strides = array<i32>} : memref<32x2304xbf16, #tpu.memory_space<vmem>>, vector<8x256xbf16>,
    %29 = vector.extract_strided_slice %19 {offsets = [2, 0, 0], sizes = [2, 8, 256], strides = [1, 1, 1]} : vector<4x8x256xbf16> to vector<2x8x256xbf16>
    %30 = vector.shape_cast %29 : vector<2x8x256xbf16> to vector<16x256xbf16>
    %c0_17 = arith.constant 0 : index
    %c1792 = arith.constant 1792 : index
    %31 = vector.load %arg7[%c0_17, %c1792] : memref<32x2304xbf16, #tpu.memory_space<vmem>>, vector<16x256xbf16>
    tpu.vector_store %arg7[%c0_17, %c1792], %30 {strides = array<i32>} : memref<32x2304xbf16, #tpu.memory_space<vmem>>, vector<16x256xbf16>,
    %32 = vector.shape_cast %20 : vector<2x8x256xbf16> to vector<16x256xbf16>
    %c16_18 = arith.constant 16 : index
    %c1792_19 = arith.constant 1792 : index
    %33 = vector.load %arg7[%c16_18, %c1792_19] : memref<32x2304xbf16, #tpu.memory_space<vmem>>, vector<16x256xbf16>
    tpu.vector_store %arg7[%c16_18, %c1792_19], %32 {strides = array<i32>} : memref<32x2304xbf16, #tpu.memory_space<vmem>>, vector<16x256xbf16>,
    %34 = vector.extract_strided_slice %1 {offsets = [0, 2, 0], sizes = [4, 8, 256], strides = [1, 1, 1]} : vector<4x10x256xbf16> to vector<4x8x256xbf16>
    %35 = vector.extract_strided_slice %3 {offsets = [0, 2, 0], sizes = [2, 8, 256], strides = [1, 1, 1]} : vector<2x10x256xbf16> to vector<2x8x256xbf16>
    %36 = vector.shape_cast %34 : vector<4x8x256xbf16> to vector<32x256xbf16>
    %c0_20 = arith.constant 0 : index
    %c512 = arith.constant 512 : index
    %37 = vector.load %arg7[%c0_20, %c512] : memref<32x2304xbf16, #tpu.memory_space<vmem>>, vector<32x256xbf16>
    tpu.vector_store %arg7[%c0_20, %c512], %36 {strides = array<i32>} : memref<32x2304xbf16, #tpu.memory_space<vmem>>, vector<32x256xbf16>,
    %38 = vector.extract_strided_slice %34 {offsets = [1, 0, 0], sizes = [3, 8, 256], strides = [1, 1, 1]} : vector<4x8x256xbf16> to vector<3x8x256xbf16>
    %39 = vector.shape_cast %38 : vector<3x8x256xbf16> to vector<24x256xbf16>
    %c0_21 = arith.constant 0 : index
    %c1280 = arith.constant 1280 : index
    %40 = vector.load %arg7[%c0_21, %c1280] : memref<32x2304xbf16, #tpu.memory_space<vmem>>, vector<24x256xbf16>
    tpu.vector_store %arg7[%c0_21, %c1280], %39 {strides = array<i32>} : memref<32x2304xbf16, #tpu.memory_space<vmem>>, vector<24x256xbf16>,
    %41 = vector.extract_strided_slice %35 {offsets = [0, 0, 0], sizes = [1, 8, 256], strides = [1, 1, 1]} : vector<2x8x256xbf16> to vector<1x8x256xbf16>
    %42 = vector.shape_cast %41 : vector<1x8x256xbf16> to vector<8x256xbf16>
    %c24_22 = arith.constant 24 : index
    %c1280_23 = arith.constant 1280 : index
    %43 = vector.load %arg7[%c24_22, %c1280_23] : memref<32x2304xbf16, #tpu.memory_space<vmem>>, vector<8x256xbf16>
    tpu.vector_store %arg7[%c24_22, %c1280_23], %42 {strides = array<i32>} : memref<32x2304xbf16, #tpu.memory_space<vmem>>, vector<8x256xbf16>,
    %44 = vector.extract_strided_slice %34 {offsets = [2, 0, 0], sizes = [2, 8, 256], strides = [1, 1, 1]} : vector<4x8x256xbf16> to vector<2x8x256xbf16>
    %45 = vector.shape_cast %44 : vector<2x8x256xbf16> to vector<16x256xbf16>
    %c0_24 = arith.constant 0 : index
    %c2048 = arith.constant 2048 : index
    %46 = vector.load %arg7[%c0_24, %c2048] : memref<32x2304xbf16, #tpu.memory_space<vmem>>, vector<16x256xbf16>
    tpu.vector_store %arg7[%c0_24, %c2048], %45 {strides = array<i32>} : memref<32x2304xbf16, #tpu.memory_space<vmem>>, vector<16x256xbf16>,
    %47 = vector.shape_cast %35 : vector<2x8x256xbf16> to vector<16x256xbf16>
    %c16_25 = arith.constant 16 : index
    %c2048_26 = arith.constant 2048 : index
    %48 = vector.load %arg7[%c16_25, %c2048_26] : memref<32x2304xbf16, #tpu.memory_space<vmem>>, vector<16x256xbf16>
    tpu.vector_store %arg7[%c16_25, %c2048_26], %47 {strides = array<i32>} : memref<32x2304xbf16, #tpu.memory_space<vmem>>, vector<16x256xbf16>,
    %c0_27 = arith.constant 0 : index
    %c0_28 = arith.constant 0 : index
    %49 = vector.load %arg7[%c0_27, %c0_28] : memref<32x2304xbf16, #tpu.memory_space<vmem>>, vector<32x2304xbf16>
    %c0_29 = arith.constant 0 : index
    %c0_30 = arith.constant 0 : index
    %50 = vector.load %arg4[%c0_29, %c0_30] : memref<2304x256xbf16, #tpu.memory_space<vmem>>, vector<2304x256xbf16>
    %cst = arith.constant dense<0.000000e+00> : vector<32x256xf32>
    %51 = tpu.matmul %49, %50, %cst {dimension_numbers = #tpu.dot_dimension_numbers<[1], [0], [0], [1], [0, 0, 1, 1], [], []>} : vector<32x2304xbf16>, vector<2304x256xbf16>, vector<32x256xf32> -> vector<32x256xf32>
    %52 = vector.shape_cast %51 : vector<32x256xf32> to vector<1x4x8x256xf32>
    %c0_31 = arith.constant 0 : index
    %c0_32 = arith.constant 0 : index
    %c0_33 = arith.constant 0 : index
    %c0_34 = arith.constant 0 : index
    %53 = vector.load %arg5[%c0_31, %c0_32, %c0_33, %c0_34] : memref<1x4x8x256xf32, #tpu.memory_space<vmem>>, vector<1x4x8x256xf32>
    tpu.vector_store %arg5[%c0_31, %c0_32, %c0_33, %c0_34], %52 {strides = array<i32>} : memref<1x4x8x256xf32, #tpu.memory_space<vmem>>, vector<1x4x8x256xf32>,
    %cst_35 = arith.constant dense<0.000000e+00> : vector<256xf32>
    %54 = vector.multi_reduction <add>, %51, %cst_35 [0] : vector<32x256xf32> to vector<256xf32>
    %55 = vector.shape_cast %54 : vector<256xf32> to vector<1x256xf32>
    %56 = arith.mulf %51, %51 : vector<32x256xf32>
    %cst_36 = arith.constant dense<0.000000e+00> : vector<256xf32>
    %57 = vector.multi_reduction <add>, %56, %cst_36 [0] : vector<32x256xf32> to vector<256xf32>
    %58 = vector.shape_cast %57 : vector<256xf32> to vector<1x256xf32>
    %cst_37 = arith.constant 0.000000e+00 : f32
    %59 = vector.broadcast %cst_37 : f32 to vector<6x256xf32>
    %60 = tpu.concatenate %55, %58, %59 in 0 : vector<1x256xf32>, vector<1x256xf32>, vector<6x256xf32> -> vector<8x256xf32>
    %61 = vector.shape_cast %60 : vector<8x256xf32> to vector<1x1x8x256xf32>
    %c0_38 = arith.constant 0 : index
    %c0_39 = arith.constant 0 : index
    %c0_40 = arith.constant 0 : index
    %c0_41 = arith.constant 0 : index
    %62 = vector.load %arg6[%c0_38, %c0_39, %c0_40, %c0_41] : memref<1x1x8x256xf32, #tpu.memory_space<vmem>>, vector<1x1x8x256xf32>
    tpu.vector_store %arg6[%c0_38, %c0_39, %c0_40, %c0_41], %61 {strides = array<i32>} : memref<1x1x8x256xf32, #tpu.memory_space<vmem>>, vector<1x1x8x256xf32>,
    return
  }
  func.func @transform_0(%arg0: i32, %arg1: i32) -> (i32, i32, i32, i32) {
    %c0_i32 = arith.constant 0 : i32
    %c0_i32_0 = arith.constant 0 : i32
    %c0_i32_1 = arith.constant 0 : i32
    return %arg0, %arg1, %c0_i32, %c0_i32_0 : i32, i32, i32, i32
  }
  func.func @transform_1(%arg0: i32, %arg1: i32) -> (i32, i32, i32, i32) {
    %c1_i32 = arith.constant 1 : i32
    %0 = arith.addi %arg1, %c1_i32 : i32
    %c2_i32 = arith.constant 2 : i32
    %1 = arith.muli %0, %c2_i32 : i32
    %c0_i32 = arith.constant 0 : i32
    %c0_i32_0 = arith.constant 0 : i32
    %c0_i32_1 = arith.constant 0 : i32
    return %arg0, %1, %c0_i32, %c0_i32_0 : i32, i32, i32, i32
  }
  func.func @transform_2(%arg0: i32, %arg1: i32) -> (i32, i32) {
    %c0_i32 = arith.constant 0 : i32
    %c0_i32_0 = arith.constant 0 : i32
    %c0_i32_1 = arith.constant 0 : i32
    return %c0_i32, %c0_i32_0 : i32, i32
  }
  func.func @transform_3(%arg0: i32, %arg1: i32) -> (i32, i32, i32, i32) {
    %c0_i32 = arith.constant 0 : i32
    %c0_i32_0 = arith.constant 0 : i32
    %c0_i32_1 = arith.constant 0 : i32
    return %arg0, %arg1, %c0_i32, %c0_i32_0 : i32, i32, i32, i32
  }
  func.func @transform_4(%arg0: i32, %arg1: i32) -> (i32, i32, i32, i32) {
    %c0_i32 = arith.constant 0 : i32
    %c0_i32_0 = arith.constant 0 : i32
    %c0_i32_1 = arith.constant 0 : i32
    return %arg0, %arg1, %c0_i32, %c0_i32_0 : i32, i32, i32, i32
  }
}

module attributes {stable_mosaic.version = 11 : i64} {
  func.func @_bn_relu_kernel(%arg0: i32, %arg1: i32, %arg2: memref<1x4x8x256xf32, #tpu.memory_space<vmem>>, %arg3: memref<1x256xf32, #tpu.memory_space<vmem>>, %arg4: memref<1x256xf32, #tpu.memory_space<vmem>>, %arg5: memref<1x4x8x256xf32, #tpu.memory_space<vmem>>) attributes {dimension_semantics = [#tpu.dimension_semantics<parallel>, #tpu.dimension_semantics<parallel>], iteration_bounds = array<i64: 2, 2>, scalar_prefetch = 0 : i64, scratch_operands = 0 : i64, tpu.core_type = #tpu.core_type<tc>, window_params = [{transform_indices = @transform_0, window_bounds = array<i64: 1, 4, 8, 256>}, {pipeline_mode = #tpu.pipeline_mode<synchronous>, transform_indices = @transform_1, window_bounds = array<i64: 1, 256>}, {pipeline_mode = #tpu.pipeline_mode<synchronous>, transform_indices = @transform_2, window_bounds = array<i64: 1, 256>}, {transform_indices = @transform_3, window_bounds = array<i64: 1, 4, 8, 256>}]} {
    %c0 = arith.constant 0 : index
    %c0_0 = arith.constant 0 : index
    %c0_1 = arith.constant 0 : index
    %c0_2 = arith.constant 0 : index
    %0 = vector.load %arg2[%c0, %c0_0, %c0_1, %c0_2] : memref<1x4x8x256xf32, #tpu.memory_space<vmem>>, vector<1x4x8x256xf32>
    %c0_3 = arith.constant 0 : index
    %c0_4 = arith.constant 0 : index
    %1 = vector.load %arg3[%c0_3, %c0_4] : memref<1x256xf32, #tpu.memory_space<vmem>>, vector<1x256xf32>
    %2 = vector.shape_cast %1 : vector<1x256xf32> to vector<1x1x1x256xf32>
    %3 = vector.broadcast %2 : vector<1x1x1x256xf32> to vector<1x4x8x256xf32>
    %4 = arith.mulf %0, %3 : vector<1x4x8x256xf32>
    %c0_5 = arith.constant 0 : index
    %c0_6 = arith.constant 0 : index
    %5 = vector.load %arg4[%c0_5, %c0_6] : memref<1x256xf32, #tpu.memory_space<vmem>>, vector<1x256xf32>
    %6 = vector.shape_cast %5 : vector<1x256xf32> to vector<1x1x1x256xf32>
    %7 = vector.broadcast %6 : vector<1x1x1x256xf32> to vector<1x4x8x256xf32>
    %8 = arith.addf %4, %7 : vector<1x4x8x256xf32>
    %cst = arith.constant 0.000000e+00 : f32
    %9 = vector.broadcast %cst : f32 to vector<1x4x8x256xf32>
    %10 = arith.maximumf %8, %9 : vector<1x4x8x256xf32>
    %c0_7 = arith.constant 0 : index
    %c0_8 = arith.constant 0 : index
    %c0_9 = arith.constant 0 : index
    %c0_10 = arith.constant 0 : index
    %11 = vector.load %arg5[%c0_7, %c0_8, %c0_9, %c0_10] : memref<1x4x8x256xf32, #tpu.memory_space<vmem>>, vector<1x4x8x256xf32>
    tpu.vector_store %arg5[%c0_7, %c0_8, %c0_9, %c0_10], %10 {strides = array<i32>} : memref<1x4x8x256xf32, #tpu.memory_space<vmem>>, vector<1x4x8x256xf32>,
    return
  }
  func.func @transform_0(%arg0: i32, %arg1: i32) -> (i32, i32, i32, i32) {
    %c0_i32 = arith.constant 0 : i32
    %c0_i32_0 = arith.constant 0 : i32
    %c0_i32_1 = arith.constant 0 : i32
    return %arg0, %arg1, %c0_i32, %c0_i32_0 : i32, i32, i32, i32
  }
  func.func @transform_1(%arg0: i32, %arg1: i32) -> (i32, i32) {
    %c0_i32 = arith.constant 0 : i32
    %c0_i32_0 = arith.constant 0 : i32
    %c0_i32_1 = arith.constant 0 : i32
    return %c0_i32, %c0_i32_0 : i32, i32
  }
  func.func @transform_2(%arg0: i32, %arg1: i32) -> (i32, i32) {
    %c0_i32 = arith.constant 0 : i32
    %c0_i32_0 = arith.constant 0 : i32
    %c0_i32_1 = arith.constant 0 : i32
    return %c0_i32, %c0_i32_0 : i32, i32
  }
  func.func @transform_3(%arg0: i32, %arg1: i32) -> (i32, i32, i32, i32) {
    %c0_i32 = arith.constant 0 : i32
    %c0_i32_0 = arith.constant 0 : i32
    %c0_i32_1 = arith.constant 0 : i32
    return %arg0, %arg1, %c0_i32, %c0_i32_0 : i32, i32, i32, i32
  }
}

</mosaic_0001>

<bundles_post_ra>
// kernel: block_of_dmt2.3
= control target key start
LH: loop header
LB: loop body
LE: loop exit
PB: predicated region body
PF: predicated region fallthrough
CT: control target
= control target key end

     0   :  { %8 = vsyncpa [#allocation3], 0  ;;  %s731_s0 = inlined_call_operand.vmem [shape: f32[2,8,8,256], index: 0, kind: input, shape index: {}]   ;;  %s732_s1 = inlined_call_operand.vmem [shape: f32[1,256], index: 1, kind: input, shape index: {}]   ;;  %s733_s2 = inlined_call_operand.vmem [shape: f32[1,256], index: 2, kind: input, shape index: {}]   ;;  %s734_s3 = inlined_call_operand.hbm [shape: f32[2,8,8,256], index: 3, kind: output, shape index: {}]  }
   0x1   :  { %10 = vsyncpa [#allocation3 + $0x1], 0  ;;  %s579_s12 = smov 0   ;;  %s581_s13 = smov 0  }
   0x2   :  { %s583_s14 = smov 0   ;;  %s585_s15 = smov 0  }
   0x3   :  { %s587_s16 = smov 0   ;;  %s589_s17 = smov 0  }
   0x4   :  { %s591_s18 = smov 0   ;;  %s593_s19 = smov 0  }
   0x5 LB: > { %s369_s20 = sadd.s32 4294967295, %s554_s19   ;;  %s370_s21 = sadd.s32 4294967294, %s554_s19   ;;  %s554_s19 = sphi %s593_s19, %s16_s19   ;;  %s550_s18 = sphi %s591_s18, %s746_s18   ;;  %s546_s17 = sphi %s589_s17, %s745_s17   ;;  %s542_s16 = sphi %s587_s16, %s744_s16   ;;  %s538_s15 = sphi %s585_s15, %s743_s15   ;;  %s534_s14 = sphi %s583_s14, %s742_s14   ;;  %s530_s13 = sphi %s581_s13, %s741_s13   ;;  %s526_s12 = sphi %s579_s12, %s740_s12  }
   0x6   : > { %s25_s22 = sadd.s32 1, %s546_s17  ;;  %s28_s23 = sadd.s32 1, %s550_s18 }
   0x7   : > { %p26_p0 = scmp.ge.s32.totalorder %s25_s22, 2  ;;  %p117_p1 = scmp.ne.s32.totalorder %s534_s14, %s530_s13 }
   0x8   : > { %p118_p2 = scmp.eq.s32.totalorder %s369_s20, 3  ;;  %p123_p5 = scmp.ne.s32.totalorder %s530_s13, %s526_s12 }
   0x9   : > { %s748_s22 = smov (%p26_p0, %s25_s22), 0  ;;  %s750_s23 = smov (!%p26_p0, %s28_s23), %s550_s18 }
   0xa   : > { %s103_s24 = ssub.s32 %s546_s17, %s748_s22  ;;  %p630_p3 = por %p118_p2, %p117_p1 }
   0xb   : > { %p30_p4 = scmp.ge.s32.totalorder %s750_s23, 2  ;;  %p124_p6 = scmp.eq.s32.totalorder %s370_s21, 3 }
   0xc   : > { %p373_p7 = scmp.ge.s32.totalorder %s554_s19, 1  ;;  %p162_p9 = scmp.lt.s32.totalorder %s554_s19, 5 }
   0xd   : > { %s752_s23 = smov (%p30_p4, %s750_s23), 0  ;;  %p639_p8 = por %p124_p6, %p123_p5 }
   0xe   : > { %737 = sst [smem:[#allocation5_spill]] %s752_s23  ;;  %s102_s27 = ssub.s32 %s550_s18, %s752_s23 }
   0xf   : > { %s107_s28 = sadd.s32 1, %s534_s14  ;;  %s104_s29 = sor.u32 %s103_s24, %s102_s27 }
  0x10   : > { %p163_p10 = pnand %p373_p7, %p162_p9  ;;  %p105_p11 = scmp.eq.s32.totalorder %s104_s29, 0 }
  0x11   : > { %s375_s4 = sshll.u32 (!%p163_p10), %s538_s15, 2  ;;  %v213_v0 = vlaneseq (!%p163_p10)  ;;  %p192_p12 = scmp.lt.s32.totalorder (!%p163_p10), %s542_s16, 1  ;;  %v211_v2 = vld [vmem:[%s732_s1] sm:$0x3] (!%p163_p10) }
  0x12   : > { %s648_s30 = scalar_select %p105_p11, %s534_s14, %s107_s28  }
  0x13   : > { %166 = sbr.rel (%p163_p10) target bundleno = 57 (0x39), region = 32  ;;  %s188_s5 = sand.u32 (!%p163_p10), 1, %s530_s13   ;;  %v214_v1 = vshrl.u32 (!%p163_p10), %v213_v0, 7  ;;  %v231_v5 = vld [vmem:[%s733_s2] sm:$0x3] (!%p163_p10) }
  0x14   : > { %p194_p13 = scmp.lt.s32.totalorder (!%p163_p10), %s375_s4, 7  ;;  %s374_s21 = sshll.u32 (!%p163_p10), %s188_s5, 6 }
  0x15   : > { %v215_v3 = vsub.s32 (!%p163_p10), 0, %v214_v1  ;;  %v219_v4 = vsub.s32 (!%p163_p10), 1, %v214_v1  ;;  %s386_s28 = sshll.u32 (!%p163_p10), %s538_s15, 3  ;;  %s382_s8 = sshll.u32 (!%p163_p10), %s542_s16, 4 }
  0x16   : > { %s667_s15 = sadd.s32 (!%p163_p10), %s386_s28, %s382_s8  ;;  %s679_s11 = scalar_lea.sflag (!%p163_p10), [#allocation3], %s188_s5 }
  0x17   : > { %v216_v6 = vrot.slane (!%p163_p10), %v211_v2, %v215_v3  ;;  %v220_v7 = vrot.slane (!%p163_p10), %v211_v2, %v219_v4  ;;  %v236_v8 = vrot.slane (!%p163_p10), %v231_v5, %v215_v3  ;;  %v240_v9 = vrot.slane (!%p163_p10), %v231_v5, %v219_v4 }
  0x1a   : > { %s193_s6 = scalar_select %p192_p12, %s542_s16, 1 }
  0x1b   : > { %s754_s4 = smov (!%p194_p13, %s375_s4), 7  ;;  %s190_s16 = scalar_lea.vmem [#allocation2], %s374_s21 }
  0x1c   : > { %s377_s9 = sshll.u32 %s193_s6, 4  ;;  %s376_s10 = sshll.u32 %s754_s4, 1 }
  0x1d   : > { %s198_s24 = sadd.s32 %s377_s9, %s376_s10  ;;  %s284_s23 = sshll.u32 %s190_s16, 4  ;;  %s670_s23 = int_to_ptr.vmem [resolvable:$true] %s284_s23 }
  0x1e   : > { %s378_s27 = sshll.u32 %s198_s24, 3  ;;  %s383_s4 = sshll.u32 %s667_s15, 7 }
  0x1f   : > { %s200_s7 = scalar_lea.vmem %s731_s0, %s378_s27  ;;  %s675_s10 = scalar_lea.hbm %s734_s3, %s383_s4 }
  0x20   : > { %v203_v10 = vld [vmem:[%s200_s7] sm:$0xff]  ;;  %v204_v11 = vld [vmem:[%s200_s7 + $0x8] sm:$0xff]  ;;  %v205_v12 = vld [vmem:[%s200_s7 + $0x10] sm:$0xff]  ;;  %s460_s20 = scalar_lea.vmem %s670_s23, 1024  ;;  %s556_s21 = smov [#allocation2]  }
  0x21   : > { %v223_v13 = vmul.f32 %v216_v6, %v203_v10  ;;  %v224_v14 = vmul.f32 %v220_v7, %v204_v11  ;;  %v225_v15 = vmul.f32 %v216_v6, %v205_v12  ;;  %v206_v16 = vld [vmem:[%s200_s7 + $0x18] sm:$0xff]  ;;  %v207_v17 = vld [vmem:[%s200_s7 + $0x20] sm:$0xff]  ;;  %v208_v18 = vld [vmem:[%s200_s7 + $0x28] sm:$0xff]  ;;  %p461_p0 = scmp.ne.s32.totalorder %s670_s23, %s460_s20  ;;  %s464_s24 = sshll.u32 %s556_s21, 4  ;;  %s465_s24 = int_to_ptr.vmem [resolvable:$false] %s464_s24 }
  0x22   : > { %v226_v19 = vmul.f32 %v220_v7, %v206_v16  ;;  %v227_v20 = vmul.f32 %v216_v6, %v207_v17  ;;  %v228_v21 = vmul.f32 %v220_v7, %v208_v18  ;;  %v209_v22 = vld [vmem:[%s200_s7 + $0x30] sm:$0xff]  ;;  %v210_v23 = vld [vmem:[%s200_s7 + $0x38] sm:$0xff]  ;;  %s466_s27 = scalar_lea.vmem %s465_s24, 2048  ;;  %p467_p4 = scmp.lt.s32.totalorder %s670_s23, %s465_s24 }
  0x23   : > { %v243_v24 = vadd.f32 %v236_v8, %v223_v13  ;;  %v244_v25 = vadd.f32 %v240_v9, %v224_v14  ;;  %v245_v26 = vadd.f32 %v236_v8, %v225_v15  ;;  %v229_v27 = vmul.f32 %v216_v6, %v209_v22  ;;  %p462_p1 = pnand %p461_p0, %p630_p3  ;;  %p468_p5 = scmp.lt.s32.totalorder %s466_s27, %s460_s20 }
  0x24   : > { %v246_v28 = vadd.f32 %v240_v9, %v226_v19  ;;  %v247_v29 = vadd.f32 %v236_v8, %v227_v20  ;;  %v248_v30 = vadd.f32 %v240_v9, %v228_v21  ;;  %v230_v31 = vmul.f32 %v220_v7, %v210_v23 }
  0x25   : > { %v251_v32 = vmax.f32 %v243_v24, 0.0  ;;  %v252_v33 = vmax.f32 %v244_v25, 0.0  ;;  %v253_v34 = vmax.f32 %v245_v26, 0.0  ;;  %v249_v35 = vadd.f32 %v236_v8, %v229_v27  ;;  %p463_p2 = pneg %p462_p1  ;;  %p469_p6 = por %p468_p5, %p467_p4 }
  0x26   : > { %v254_v36 = vmax.f32 %v246_v28, 0.0  ;;  %v255_v37 = vmax.f32 %v247_v29, 0.0  ;;  %v256_v38 = vmax.f32 %v248_v30, 0.0  ;;  %v250_v39 = vadd.f32 %v240_v9, %v230_v31 }
  0x27   : > { %259 = vst [vmem:[%s190_s16] sm:$0xff] %v251_v32  ;;  %260 = vst [vmem:[%s190_s16 + $0x8] sm:$0xff] %v252_v33  ;;  %v257_v40 = vmax.f32 %v249_v35, 0.0  ;;  %p470_p7 = pnand %p469_p6, %p463_p2 }
  0x28   : > { %261 = vst [vmem:[%s190_s16 + $0x10] sm:$0xff] %v253_v34  ;;  %262 = vst [vmem:[%s190_s16 + $0x18] sm:$0xff] %v254_v36  ;;  %v258_v41 = vmax.f32 %v250_v39, 0.0 }
  0x29   : > { %263 = vst [vmem:[%s190_s16 + $0x20] sm:$0xff] %v255_v37  ;;  %264 = vst [vmem:[%s190_s16 + $0x28] sm:$0xff] %v256_v38 }
  0x2a   : > { %265 = vst [vmem:[%s190_s16 + $0x30] sm:$0xff] %v257_v40  ;;  %266 = vst [vmem:[%s190_s16 + $0x38] sm:$0xff] %v258_v41 }
  0x2b   : > { %473 = shalt.err (!%p470_p7)
}
  0x2c   : > { %s474_s5 = scalar_lea.hbm %s675_s10, 1024  ;;  %s478_s7 = scalar_lea.hbm %s734_s3, 4096 }
  0x2d   : > { %p475_p9 = scmp.ne.s32.totalorder %s675_s10, %s474_s5  ;;  %p479_p12 = scmp.lt.u32.totalorder %s675_s10, %s734_s3 }
  0x2e   : > { %p480_p13 = scmp.lt.u32.totalorder %s478_s7, %s474_s5  ;;  %p482_p1 = scmp.lt.u32.totalorder %s474_s5, %s675_s10 }
  0x2f   : > { %p476_p10 = pnand %p475_p9, %p630_p3 }
  0x30   : > { %p481_p0 = por %p480_p13, %p479_p12 }
  0x31   : > { %p477_p11 = pneg %p476_p10 }
  0x32   : > { %p483_p2 = por %p482_p1, %p481_p0 }
  0x34   : > { %p484_p4 = pnand %p483_p2, %p477_p11 }
  0x36   : > { %487 = shalt.err (!%p484_p4)
}
  0x37   : > { %s557_s16 = smov 256   ;;  %s558_s4 = smov 16  }
  0x38   : > { %387 = dma.vmem_to_hbm [thread:$0]  (%p630_p3), %s670_s23, 1024, %s675_s10, %s679_s11, %s557_s16, %s557_s16, %s558_s4  }
  0x39 PF: > { %p393_p5 = scmp.ge.s32.totalorder %s554_s19, 2  ;;  %s299_s6 = sand.u32 1, %s526_s12  }
  0x3a   : > { %s300_s9 = scalar_lea.sflag [#allocation3], %s299_s6 }
  0x3b   : > { %p390_p6 = pnand %p393_p5, %p639_p8 }
  0x3d   : > { %521 = dma.done.wait (!%p390_p6), %s300_s9, 1024  }
  0x3e   : > { %523 = vsyncadd (!%p390_p6), %s300_s9, 4294966272  ;;  %s16_s19 = sadd.s32 1, %s554_s19   ;;  %s739_s25 = sld [smem:[#allocation5_spill]] }
  0x3f   : > { %p13_p7 = scmp.ge.s32.totalorder %s16_s19, 6   ;;  %s740_s12 = smov %s530_s13 }
  0x40   : > { %s741_s13 = smov %s534_s14  ;;  %s742_s14 = smov %s648_s30 }
  0x41   : > { %s743_s15 = smov %s546_s17  ;;  %s744_s16 = smov %s550_s18 }
  0x42   : > { %s745_s17 = smov %s748_s22  ;;  %15 = sbr.rel (!%p13_p7) target bundleno = 5 (0x5), region = 67 }
  0x44   : > { %s746_s18 = smov %s739_s25 }
  0x49   :  { %305 = vsyncpa [#allocation3], 1 }
  0x4a   :  { %307 = vsyncpa [#allocation3 + $0x1], 1 }

// kernel: block_of_dmt2.2
= control target key start
LH: loop header
LB: loop body
LE: loop exit
PB: predicated region body
PF: predicated region fallthrough
CT: control target
= control target key end

     0   :  { %s4138_s15 = smov 0   ;;  %s4140_s16 = smov 0   ;;  %s5320_s0 = inlined_call_operand.vmem [shape: bf16[2,10,10,256], index: 0, kind: input, shape index: {}, may-alias: {0,1}]   ;;  %s5321_s1 = inlined_call_operand.vmem [shape: bf16[2,10,10,256], index: 1, kind: input, shape index: {}, may-alias: {0,1}]   ;;  %s5322_s2 = inlined_call_operand.vmem [shape: bf16[2304,256], index: 2, kind: input, shape index: {}]   ;;  %s5323_s3 = inlined_call_operand.vmem [shape: f32[2,8,8,256], index: 3, kind: output, shape index: {0}]   ;;  %s5324_s4 = inlined_call_operand.vmem [shape: f32[2,2,8,256], index: 4, kind: output, shape index: {1}]  }
   0x1   :  { %s4142_s17 = smov 0   ;;  %s4144_s18 = smov 0  }
   0x2   :  { %s4146_s19 = smov 0  }
   0x3 LB: > { %s24_s20 = sadd.s32 1, %s4103_s17  ;;  %s27_s21 = sadd.s32 1, %s4107_s18  ;;  %s4111_s19 = sphi %s4146_s19, %s15_s19   ;;  %s4107_s18 = sphi %s4144_s18, %s5332_s18   ;;  %s4103_s17 = sphi %s4142_s17, %s5331_s17   ;;  %s4099_s16 = sphi %s4140_s16, %s5330_s16   ;;  %s4095_s15 = sphi %s4138_s15, %s5329_s15  }
   0x4   : > { %p25_p0 = scmp.ge.s32.totalorder %s24_s20, 2  ;;  %p3134_p1 = scmp.ge.s32.totalorder %s4111_s19, 1 }
   0x5   : > { %p227_p2 = scmp.lt.s32.totalorder %s4111_s19, 5 }
   0x6   : > { %s5334_s20 = smov (%p25_p0, %s24_s20), 0  ;;  %s5336_s21 = smov (!%p25_p0, %s27_s21), %s4107_s18 }
   0x7   : > { %p228_p3 = pnand %p3134_p1, %p227_p2  ;;  %p29_p4 = scmp.ge.s32.totalorder %s5336_s21, 2 }
   0x8   : > { %v3625_v0 = vld [vmem:[%s5322_s2 + $0x4] ss:$8 sps:$4 sm:$0xff] (!%p228_p3)   ;;  %v3629_v2 = vld [vmem:[%s5322_s2] ss:$8 sps:$4 sm:$0xff] (!%p228_p3)   ;;  %v3631_v4 = vld [vmem:[%s5322_s2 + $0x14] ss:$8 sps:$4 sm:$0xff] (!%p228_p3)  }
   0x9   : > { %s5338_s21 = smov (%p29_p4, %s5336_s21), 0  ;;  %231 = sbr.rel (%p228_p3) target bundleno = 571 (0x23b), region = 32 }
   0xa   : > { %v3627_v1 = vld [vmem:[%s5322_s2 + $0x404] ss:$8 sps:$4 sm:$0xff] (!%p228_p3)   ;;  %2418 = vmatprep.subr.bf16.mxu1 (!%p228_p3), %v3625_v0  ;;  %v3630_v3 = vld [vmem:[%s5322_s2 + $0x400] ss:$8 sps:$4 sm:$0xff] (!%p228_p3)   ;;  %v3633_v5 = vld [vmem:[%s5322_s2 + $0x414] ss:$8 sps:$4 sm:$0xff] (!%p228_p3)  }
   0xb   : > { %2630 = vmatprep.subr.bf16.mxu0 (!%p228_p3), %v3627_v1  ;;  %2419 = vmatpush1.bf16.msra.mxu1 (!%p228_p3), %v3629_v2  ;;  %v3635_v6 = vld [vmem:[%s5322_s2 + $0x10] ss:$8 sps:$4 sm:$0xff] (!%p228_p3)   ;;  %v3637_v8 = vld [vmem:[%s5322_s2 + $0x24] ss:$8 sps:$4 sm:$0xff] (!%p228_p3)   ;;  %v3641_v10 = vld [vmem:[%s5322_s2 + $0x20] ss:$8 sps:$4 sm:$0xff] (!%p228_p3)  }
   0xc   : > { %2631 = vmatpush1.bf16.msra.mxu0 (!%p228_p3), %v3630_v3  ;;  %2420 = vmatprep.subr.bf16.mxu1 (!%p228_p3), %v3631_v4  ;;  %v3636_v7 = vld [vmem:[%s5322_s2 + $0x410] ss:$8 sps:$4 sm:$0xff] (!%p228_p3)   ;;  %v3639_v9 = vld [vmem:[%s5322_s2 + $0x424] ss:$8 sps:$4 sm:$0xff] (!%p228_p3)   ;;  %v3642_v11 = vld [vmem:[%s5322_s2 + $0x420] ss:$8 sps:$4 sm:$0xff] (!%p228_p3)  }
   0xd   : > { %2632 = vmatprep.subr.bf16.mxu0 (!%p228_p3), %v3633_v5  ;;  %v3643_v12 = vld [vmem:[%s5322_s2 + $0x34] ss:$8 sps:$4 sm:$0xff] (!%p228_p3)   ;;  %v3647_v14 = vld [vmem:[%s5322_s2 + $0x30] ss:$8 sps:$4 sm:$0xff] (!%p228_p3)   ;;  %v3649_v16 = vld [vmem:[%s5322_s2 + $0x44] ss:$8 sps:$4 sm:$0xff] (!%p228_p3)  }
   0xe   : > { %v3645_v13 = vld [vmem:[%s5322_s2 + $0x434] ss:$8 sps:$4 sm:$0xff] (!%p228_p3)   ;;  %v3648_v15 = vld [vmem:[%s5322_s2 + $0x430] ss:$8 sps:$4 sm:$0xff] (!%p228_p3)   ;;  %v3651_v17 = vld [vmem:[%s5322_s2 + $0x444] ss:$8 sps:$4 sm:$0xff] (!%p228_p3)  }
   0xf   : > { %2421 = vmatpush1.bf16.msra.mxu1 (!%p228_p3), %v3635_v6  ;;  %v3653_v18 = vld [vmem:[%s5322_s2 + $0x40] ss:$8 sps:$4 sm:$0xff] (!%p228_p3)   ;;  %v3655_v20 = vld [vmem:[%s5322_s2 + $0x54] ss:$8 sps:$4 sm:$0xff] (!%p228_p3)   ;;  %v3659_v22 = vld [vmem:[%s5322_s2 + $0x50] ss:$8 sps:$4 sm:$0xff] (!%p228_p3)  }
  0x10   : > { %2633 = vmatpush1.bf16.msra.mxu0 %v3636_v7  ;;  %2422 = vmatprep.subr.bf16.mxu1 %v3637_v8  ;;  %v3654_v19 = vld [vmem:[%s5322_s2 + $0x440] ss:$8 sps:$4 sm:$0xff]   ;;  %v3657_v21 = vld [vmem:[%s5322_s2 + $0x454] ss:$8 sps:$4 sm:$0xff]   ;;  %v3660_v23 = vld [vmem:[%s5322_s2 + $0x450] ss:$8 sps:$4 sm:$0xff]  }
  0x11   : > { %2634 = vmatprep.subr.bf16.mxu0 %v3639_v9  ;;  %v3661_v24 = vld [vmem:[%s5322_s2 + $0x64] ss:$8 sps:$4 sm:$0xff]   ;;  %s4248_s8 = sshll.u32 %s4095_s15, 2  ;;  %p297_p5 = scmp.lt.s32.totalorder %s4099_s16, 1  ;;  %v3665_v26 = vld [vmem:[%s5322_s2 + $0x60] ss:$8 sps:$4 sm:$0xff]  }
  0x12   : > { %v3663_v25 = vld [vmem:[%s5322_s2 + $0x464] ss:$8 sps:$4 sm:$0xff]   ;;  %v3666_v27 = vld [vmem:[%s5322_s2 + $0x460] ss:$8 sps:$4 sm:$0xff]   ;;  %p299_p6 = scmp.lt.s32.totalorder %s4248_s8, 9  ;;  %vm576_vm2 = vcmask 1042432  }
  0x13   : > { %2423 = vmatpush1.bf16.msra.mxu1 %v3641_v10  ;;  %v3667_v28 = vld [vmem:[%s5322_s2 + $0x74] ss:$8 sps:$4 sm:$0xff]   ;;  %s5340_s16 = smov (!%p297_p5, %s4099_s16), 1  ;;  %v3671_v30 = vld [vmem:[%s5322_s2 + $0x70] ss:$8 sps:$4 sm:$0xff]   ;;  %vm577_vm3 = vcmask 1046532  }
  0x14   : > { %2635 = vmatpush1.bf16.msra.mxu0 %v3642_v11  ;;  %2424 = vmatprep.subr.bf16.mxu1 %v3643_v12  ;;  %v3669_v29 = vld [vmem:[%s5322_s2 + $0x474] ss:$8 sps:$4 sm:$0xff]   ;;  %s300_s28 = scalar_select %p299_p6, %s4248_s8, 9  ;;  %v3672_v31 = vld [vmem:[%s5322_s2 + $0x470] ss:$8 sps:$4 sm:$0xff]   ;;  %vm4387_vm5 = vmor %vm576_vm2, %vm577_vm3  ;;  %vm2947_vm6 = vcmask 1040384  }
  0x15   : > { %2636 = vmatprep.subr.bf16.mxu0 %v3645_v13  ;;  %v3673_v32 = vld [vmem:[%s5322_s2 + $0x84] ss:$8 sps:$4 sm:$0xff]   ;;  %s3584_s10 = smul.u32 40, %s5340_s16  ;;  %v3677_v34 = vld [vmem:[%s5322_s2 + $0x80] ss:$8 sps:$4 sm:$0xff]   ;;  %p331_p8 = scmp.lt.s32.totalorder %s4248_s8, 7 }
  0x16   : > { %v3675_v33 = vld [vmem:[%s5322_s2 + $0x484] ss:$8 sps:$4 sm:$0xff]   ;;  %v3678_v35 = vld [vmem:[%s5322_s2 + $0x480] ss:$8 sps:$4 sm:$0xff]   ;;  %s3136_s22 = sshll.u32 %s300_s28, 2  ;;  %s3144_s24 = sshll.u32 %s5340_s16, 4 }
  0x17   : > { %2425 = vmatpush1.bf16.msra.mxu1 %v3647_v14  ;;  %v3679_v36 = vld [vmem:[%s5322_s2 + $0x94] ss:$8 sps:$4 sm:$0xff]   ;;  %s303_s27 = sadd.s32 %s3584_s10, %s3136_s22  ;;  %v3683_v38 = vld [vmem:[%s5322_s2 + $0x90] ss:$8 sps:$4 sm:$0xff]   ;;  %v3685_v40 = vld [vmem:[%s5322_s2 + $0xa4] ss:$8 sps:$4 sm:$0xff]  }
  0x18   : > { %2637 = vmatpush1.bf16.msra.mxu0 %v3648_v15  ;;  %2426 = vmatprep.subr.bf16.mxu1 %v3649_v16  ;;  %v3681_v37 = vld [vmem:[%s5322_s2 + $0x494] ss:$8 sps:$4 sm:$0xff]   ;;  %v3684_v39 = vld [vmem:[%s5322_s2 + $0x490] ss:$8 sps:$4 sm:$0xff]   ;;  %v3687_v41 = vld [vmem:[%s5322_s2 + $0x4a4] ss:$8 sps:$4 sm:$0xff]  }
  0x19   : > { %2638 = vmatprep.subr.bf16.mxu0 %v3651_v17  ;;  %s3137_s12 = sshll.u32 %s303_s27, 2  ;;  %v3689_v42 = vld [vmem:[%s5322_s2 + $0xa0] ss:$8 sps:$4 sm:$0xff]   ;;  %v3691_v44 = vld [vmem:[%s5322_s2 + $0xb4] ss:$8 sps:$4 sm:$0xff]   ;;  %s3487_s22 = sadd.s32 4, %s4248_s8 }
  0x1a   : > { %v3690_v43 = vld [vmem:[%s5322_s2 + $0x4a0] ss:$8 sps:$4 sm:$0xff]   ;;  %s4322_s30 = scalar_lea.vmem %s5320_s0, %s3137_s12  ;;  %v3693_v45 = vld [vmem:[%s5322_s2 + $0x4b4] ss:$8 sps:$4 sm:$0xff]   ;;  %vm416_vm0 = vsmask.f32 3328 }
  0x1b   : > { %2427 = vmatpush1.bf16.msra.mxu1 %v3653_v18  ;;  %v3695_v46 = vld [vmem:[%s5322_s2 + $0xb0] ss:$8 sps:$4 sm:$0xff]   ;;  %v4334_v48 = vld [vmem:[%s4322_s30] sm:$0xff]  ;;  %vm417_vm1 = vsmask.f32 7440  ;;  %p318_p7 = scmp.lt.s32.totalorder %s3487_s22, 9 }
  0x1c   : > { %2639 = vmatpush1.bf16.msra.mxu0 %v3654_v19  ;;  %2428 = vmatprep.subr.bf16.mxu1 %v3655_v20  ;;  %v3696_v47 = vld [vmem:[%s5322_s2 + $0x4b0] ss:$8 sps:$4 sm:$0xff]   ;;  %v3697_v50 = vld [vmem:[%s5322_s2 + $0xc4] ss:$8 sps:$4 sm:$0xff]   ;;  %v3701_v63 = vld [vmem:[%s5322_s2 + $0xc0] ss:$8 sps:$4 sm:$0xff]  }
  0x1d   : > { %2640 = vmatprep.subr.bf16.mxu0 %v3657_v21  ;;  %v4337_v49 = vld [vmem:[%s4322_s30 + $0x10] sm:$0xff]  ;;  %v3699_v51 = vld [vmem:[%s5322_s2 + $0x4c4] ss:$8 sps:$4 sm:$0xff]   ;;  %v351_v53 = vld [vmem:[%s4322_s30 + $0x18] sm:$0x11]  ;;  %s5342_s22 = smov (!%p318_p7, %s3487_s22), 9 }
  0x1e   : > { %v3150_v52 = vcombine.high %v4334_v48, %v4337_v49  ;;  %v3149_v54 = vcombine.low %v4334_v48, %v4337_v49  ;;  %v4351_v55 = vld [vmem:[%s4322_s30 + $0x20] sm:$0xff]  ;;  %v353_v56 = vld [vmem:[%s4322_s30 + $0x28] sm:$0x11]  ;;  %v434_v57 = vshrl.u32 %v4337_v49, 16  ;;  %v437_v58 = vshll.u32 %v4337_v49, 16  ;;  %vm4375_vm4 = vmor %vm416_vm0, %vm417_vm1  ;;  %s3140_s5 = sshll.u32 %s5342_s22, 2 }
  0x1f   : > { %2429 = vmatpush1.bf16.msra.mxu1 %v3659_v22  ;;  %v443_v59 = vshll.u32 %v351_v53, 16  ;;  %v448_v60 = vshrl.u32 %v4351_v55, 16  ;;  %v451_v61 = vshll.u32 %v4351_v55, 16  ;;  %v457_v62 = vshll.u32 %v353_v56, 16  ;;  %v3702_v2 = vld [vmem:[%s5322_s2 + $0x4c0] ss:$8 sps:$4 sm:$0xff]   ;;  %s322_s22 = sadd.s32 %s3584_s10, %s3140_s5 }
  0x20   : > { %2641 = vmatpush1.bf16.msra.mxu0 %v3660_v23  ;;  %2430 = vmatprep.subr.bf16.mxu1 %v3661_v24  ;;  %v436_v0 = vrot.slane %v434_v57, 4  ;;  %v439_v1 = vrot.slane %v437_v58, 5  ;;  %v3703_v5 = vld [vmem:[%s5322_s2 + $0xd4] ss:$8 sps:$4 sm:$0xff]   ;;  %v3707_v9 = vld [vmem:[%s5322_s2 + $0xd0] ss:$8 sps:$4 sm:$0xff]  }
  0x21   : > { %2642 = vmatprep.subr.bf16.mxu0 %v3663_v25  ;;  %2450 = vmatprep.mubr.bf16.mxu1 %v3150_v52  ;;  %v450_v3 = vrot.slane %v448_v60, 4  ;;  %v453_v4 = vrot.slane %v451_v61, 5  ;;  %v3705_v6 = vld [vmem:[%s5322_s2 + $0x4d4] ss:$8 sps:$4 sm:$0xff]   ;;  %v445_v8 = vrot.slane %v443_v59, 5  ;;  %v459_v12 = vrot.slane %v457_v62, 5 }
  0x22   : > { %v440_v7 = vor.u32 %v439_v1, %v436_v0  ;;  %v3708_v13 = vld [vmem:[%s5322_s2 + $0x4d0] ss:$8 sps:$4 sm:$0xff]   ;;  %v3709_v14 = vld [vmem:[%s5322_s2 + $0xe4] ss:$8 sps:$4 sm:$0xff]   ;;  %v3174_v18 = vrot.slane %v4337_v49, 9  ;;  %v585_v21 = vrot.slane %v351_v53, 5 }
  0x23   : > { %2431 = vmatpush1.bf16.msra.mxu1 %v3665_v26  ;;  %v454_v11 = vor.u32 %v453_v4, %v450_v3  ;;  %v3711_v19 = vld [vmem:[%s5322_s2 + $0x4e4] ss:$8 sps:$4 sm:$0xff]   ;;  %v3175_v22 = vrot.slane %v4351_v55, 9  ;;  %v3713_v24 = vld [vmem:[%s5322_s2 + $0xe0] ss:$8 sps:$4 sm:$0xff]   ;;  %v420_v53 = vshrl.u32 %v4334_v48, 16 }
  0x24   : > { %2643 = vmatpush1.bf16.msra.mxu0 %v3666_v27  ;;  %2432 = vmatprep.subr.bf16.mxu1 %v3667_v28  ;;  %v441_v15 = vrot.slane %v440_v7, 4  ;;  %v3714_v25 = vld [vmem:[%s5322_s2 + $0x4e0] ss:$8 sps:$4 sm:$0xff]   ;;  %v4416_v28 = vsel %vm4387_vm5, %v3174_v18, %v585_v21  ;;  %v3746_v52 = vld [vmem:[%s5322_s2 + $0x534] ss:$8 sps:$4 sm:$0xff]   ;;  %s3141_s26 = sshll.u32 %s322_s22, 2 }
  0x25   : > { %2644 = vmatprep.subr.bf16.mxu0 %v3669_v29  ;;  %v455_v16 = vrot.slane %v454_v11, 4  ;;  %v589_v29 = vrot.slane %v353_v56, 5  ;;  %v3741_v56 = vld [vmem:[%s5322_s2 + $0x130] ss:$8 sps:$4 sm:$0xff]   ;;  %v3749_v58 = vld [vmem:[%s5322_s2 + $0x144] ss:$8 sps:$4 sm:$0xff]   ;;  %s4515_s13 = scalar_lea.vmem %s5321_s1, %s3141_s26 }
  0x26   : > { %v4397_v20 = vsel %vm4375_vm4, %v441_v15, %v445_v8  ;;  %v3744_v57 = vld [vmem:[%s5322_s2 + $0x530] ss:$8 sps:$4 sm:$0xff]   ;;  %v3752_v59 = vld [vmem:[%s5322_s2 + $0x544] ss:$8 sps:$4 sm:$0xff]   ;;  %v422_v60 = vrot.slane %v420_v53, 4  ;;  %s5344_s8 = smov (!%p331_p8, %s4248_s8), 7 }
  0x27   : > { %2433 = vmatpush1.bf16.msra.mxu1 %v3671_v30  ;;  %v4402_v23 = vsel %vm4375_vm4, %v455_v16, %v459_v12  ;;  %v3715_v30 = vld [vmem:[%s5322_s2 + $0xf4] ss:$8 sps:$4 sm:$0xff]   ;;  %v3747_v62 = vld [vmem:[%s5322_s2 + $0x140] ss:$8 sps:$4 sm:$0xff]   ;;  %v3756_v3 = vld [vmem:[%s5322_s2 + $0x550] ss:$8 sps:$4 sm:$0xff]  }
  0x28   : > { %2645 = vmatpush1.bf16.msra.mxu0 %v3672_v31  ;;  %2434 = vmatprep.subr.bf16.mxu1 %v3673_v32  ;;  %v3166_v26 = vcombine.high %v4397_v20, %v4402_v23  ;;  %v3165_v27 = vcombine.low %v4397_v20, %v4402_v23  ;;  %v3717_v31 = vld [vmem:[%s5322_s2 + $0x4f4] ss:$8 sps:$4 sm:$0xff]   ;;  %v4426_v32 = vsel %vm4387_vm5, %v3175_v22, %v589_v29  ;;  %v3764_v12 = vld [vmem:[%s5322_s2 + $0x564] ss:$8 sps:$4 sm:$0xff]   ;;  %v3759_v22 = vld [vmem:[%s5322_s2 + $0x160] ss:$8 sps:$4 sm:$0xff]  }
  0x29   : > { %2646 = vmatprep.subr.bf16.mxu0 %v3675_v33  ;;  %v3182_v33 = vcombine.high %v4416_v28, %v4426_v32  ;;  %v3755_v0 = vld [vmem:[%s5322_s2 + $0x154] ss:$8 sps:$4 sm:$0xff]   ;;  %v4548_v16 = vld [vmem:[%s4515_s13 + $0x8] sm:$0x11]  ;;  %v3925_v17 = vld [vmem:[%s5322_s2 + $0x310] ss:$8 sps:$4 sm:$0xff]  }
  0x2a   : > { %2662 = vmatprep.mubr.bf16.mxu0 %v3166_v26  ;;  %v3758_v1 = vld [vmem:[%s5322_s2 + $0x554] ss:$8 sps:$4 sm:$0xff]   ;;  %v3762_v29 = vld [vmem:[%s5322_s2 + $0x560] ss:$8 sps:$4 sm:$0xff]   ;;  %v3921_v10 = vld [vmem:[%s5322_s2 + $0x304] ss:$8 sps:$4 sm:$0xff]  }
  0x2b   : > { %2435 = vmatpush1.bf16.msra.mxu1 %v3677_v34  ;;  %v3181_v34 = vcombine.low %v4416_v28, %v4426_v32  ;;  %v4524_v4 = vld [vmem:[%s4322_s30 + $0x30] sm:$0xff]  ;;  %s3143_s23 = sshll.u32 %s5344_s8, 1  ;;  %p341_p9 = scmp.lt.s32.totalorder %s4095_s15, 1  ;;  %vm2950_vm7 = vcmask 1041408  }
  0x2c   : > { %2647 = vmatpush1.bf16.msra.mxu0 %v3678_v35  ;;  %2436 = vmatprep.subr.bf16.mxu1 %v3679_v36  ;;  %v3719_v35 = vld [vmem:[%s5322_s2 + $0xf0] ss:$8 sps:$4 sm:$0xff]   ;;  %v4531_v7 = vcombine.high %v4351_v55, %v4524_v4  ;;  %v462_v8 = vshrl.u32 %v4524_v4, 16  ;;  %v4537_v11 = vcombine.low %v4351_v55, %v4524_v4  ;;  %v3176_v15 = vrot.slane %v4524_v4, 9  ;;  %s3147_s10 = sshll.u32 %s5340_s16, 2 }
  0x2d   : > { %2648 = vmatprep.subr.bf16.mxu0 %v3681_v37  ;;  %v3720_v36 = vld [vmem:[%s5322_s2 + $0x4f0] ss:$8 sps:$4 sm:$0xff]   ;;  %v3724_v37 = vld [vmem:[%s5322_s2 + $0x104] ss:$8 sps:$4 sm:$0xff]   ;;  %s5346_s15 = smov (!%p341_p9, %s4095_s15), 1 }
  0x2e   : > { %v464_v18 = vrot.slane %v462_v8, 4  ;;  %v3774_v8 = vld [vmem:[%s5322_s2 + $0x580] ss:$8 sps:$4 sm:$0xff]   ;;  %s3146_s8 = sshll.u32 %s5346_s15, 1 }
  0x2f   : > { %2437 = vmatpush1.bf16.msra.mxu1 %v3683_v38  ;;  %v3727_v38 = vld [vmem:[%s5322_s2 + $0x504] ss:$8 sps:$4 sm:$0xff]   ;;  %s345_s28 = sadd.s32 %s3147_s10, %s3146_s8 }
  0x30   : > { %2649 = vmatpush1.bf16.msra.mxu0 %v3684_v39  ;;  %2438 = vmatprep.subr.bf16.mxu1 %v3685_v40  ;;  %v3722_v39 = vld [vmem:[%s5322_s2 + $0x100] ss:$8 sps:$4 sm:$0xff]   ;;  %s3148_s5 = sshll.u32 %s345_s28, 3 }
  0x31   : > { %2650 = vmatprep.subr.bf16.mxu0 %v3687_v41  ;;  %v3725_v40 = vld [vmem:[%s5322_s2 + $0x500] ss:$8 sps:$4 sm:$0xff]   ;;  %v3731_v41 = vld [vmem:[%s5322_s2 + $0x114] ss:$8 sps:$4 sm:$0xff]   ;;  %s347_s6 = scalar_lea.vmem %s5324_s4, %s3148_s5 }
  0x33   : > { %2439 = vmatpush1.bf16.msra.mxu1 %v3689_v42  ;;  %v3734_v42 = vld [vmem:[%s5322_s2 + $0x514] ss:$8 sps:$4 sm:$0xff]  }
  0x34   : > { %2651 = vmatpush1.bf16.msra.mxu0 %v3690_v43  ;;  %2440 = vmatprep.subr.bf16.mxu1 %v3691_v44  ;;  %v3729_v43 = vld [vmem:[%s5322_s2 + $0x110] ss:$8 sps:$4 sm:$0xff]  }
  0x35   : > { %2652 = vmatprep.subr.bf16.mxu0 %v3693_v45  ;;  %v3732_v44 = vld [vmem:[%s5322_s2 + $0x510] ss:$8 sps:$4 sm:$0xff]   ;;  %v3737_v45 = vld [vmem:[%s5322_s2 + $0x124] ss:$8 sps:$4 sm:$0xff]  }
  0x37   : > { %2441 = vmatpush1.bf16.msra.mxu1 %v3695_v46  ;;  %v3740_v46 = vld [vmem:[%s5322_s2 + $0x524] ss:$8 sps:$4 sm:$0xff]  }
  0x38   : > { %2653 = vmatpush1.bf16.msra.mxu0 %v3696_v47  ;;  %2442 = vmatprep.subr.bf16.mxu1 %v3697_v50  ;;  %v3735_v47 = vld [vmem:[%s5322_s2 + $0x120] ss:$8 sps:$4 sm:$0xff]  }
  0x39   : > { %2654 = vmatprep.subr.bf16.mxu0 %v3699_v51  ;;  %v3738_v50 = vld [vmem:[%s5322_s2 + $0x520] ss:$8 sps:$4 sm:$0xff]   ;;  %v3743_v51 = vld [vmem:[%s5322_s2 + $0x134] ss:$8 sps:$4 sm:$0xff]  }
  0x3b   : > { %2443 = vmatpush1.bf16.msra.mxu1 %v3701_v63  ;;  %v3750_v63 = vld [vmem:[%s5322_s2 + $0x540] ss:$8 sps:$4 sm:$0xff]  }
  0x3c   : > { %2655 = vmatpush1.bf16.msra.mxu0 %v3702_v2  ;;  %2444 = vmatprep.subr.bf16.mxu1 %v3703_v5  ;;  %v3753_v2 = vld [vmem:[%s5322_s2 + $0x150] ss:$8 sps:$4 sm:$0xff]  }
  0x3d   : > { %2656 = vmatprep.subr.bf16.mxu0 %v3705_v6  ;;  %v3761_v6 = vld [vmem:[%s5322_s2 + $0x164] ss:$8 sps:$4 sm:$0xff]  }
  0x3f   : > { %2445 = vmatpush1.bf16.msra.mxu1 %v3707_v9  ;;  %v465_v9 = vshll.u32 %v4524_v4, 16 }
  0x40   : > { %2657 = vmatpush1.bf16.msra.mxu0 %v3708_v13  ;;  %2446 = vmatprep.subr.bf16.mxu1 %v3709_v14  ;;  %v355_v13 = vld [vmem:[%s4322_s30 + $0x38] sm:$0x11]  ;;  %v4544_v14 = vld [vmem:[%s4515_s13] sm:$0xff] }
  0x41   : > { %2658 = vmatprep.subr.bf16.mxu0 %v3711_v19  ;;  %v467_v19 = vrot.slane %v465_v9, 5  ;;  %v471_v21 = vshll.u32 %v355_v13, 16 }
  0x43   : > { %2447 = vmatpush1.bf16.msra.mxu1 %v3713_v24  ;;  %v3170_v24 = vcombine.high %v4544_v14, %v4548_v16 }
  0x44   : > { %2659 = vmatpush1.bf16.msra.mxu0 %v3714_v25  ;;  %2448 = vmatprep.subr.bf16.mxu1 %v3715_v30  ;;  %v3169_v25 = vcombine.low %v4544_v14, %v4548_v16  ;;  %v468_v30 = vor.u32 %v467_v19, %v464_v18  ;;  %v3782_v18 = vld [vmem:[%s5322_s2 + $0x594] ss:$8 sps:$4 sm:$0xff]  }
  0x45   : > { %2660 = vmatprep.subr.bf16.mxu0 %v3717_v31  ;;  %v473_v31 = vrot.slane %v471_v21, 5 }
  0x47   : > { %2449 = vmatpush1.bf16.msra.mxu1 %v3719_v35  ;;  %v3173_v35 = vrot.slane %v4334_v48, 9 }
  0x48   : > { %2661 = vmatpush1.bf16.msra.mxu0 %v3720_v36  ;;  %2471 = vmatprep.subr.bf16.mxu1 %v3724_v37  ;;  %v3767_v36 = vld [vmem:[%s5322_s2 + $0x174] ss:$8 sps:$4 sm:$0xff]   ;;  %v521_v37 = vshrl.u32 %v3170_v24, 16 }
  0x49   : > { %2683 = vmatprep.subr.bf16.mxu0 %v3727_v38  ;;  %v524_v38 = vshll.u32 %v3170_v24, 16 }
  0x4a   : > { %2451 = vmatmul.mubr.bf16.vlgmr.msra.gmra.mrb[0].mxu1 %v3149_v54  ;;  %v423_v54 = vshll.u32 %v4334_v48, 16 }
  0x4b   : > { %2663 = vmatmul.mubr.bf16.vlgmr.msra.gmra.mrb[0].mxu0 %v3165_v27  ;;  %2472 = vmatpush1.bf16.msra.mxu1 %v3722_v39  ;;  %v593_v27 = vrot.slane %v355_v13, 5  ;;  %v513_v39 = vshrl.u32 %v3169_v25, 16 }
  0x4c   : > { %2684 = vmatpush1.bf16.msra.mxu0 %v3725_v40  ;;  %2473 = vmatprep.subr.bf16.mxu1 %v3731_v41  ;;  %v425_v61 = vrot.slane %v423_v54, 5  ;;  %v516_v40 = vshll.u32 %v3169_v25, 16  ;;  %v3770_v41 = vld [vmem:[%s5322_s2 + $0x574] ss:$8 sps:$4 sm:$0xff]   ;;  %v627_v54 = vrot.slane %v3169_v25, 5 }
  0x4d   : > { %2685 = vmatprep.subr.bf16.mxu0 %v3734_v42  ;;  %2460 = vmatprep.mubr.bf16.mxu1 %v4531_v7  ;;  %v469_v42 = vrot.slane %v468_v30, 4  ;;  %v4571_v48 = vsel %vm4387_vm5, %v3176_v15, %v593_v27  ;;  %v3779_v15 = vld [vmem:[%s5322_s2 + $0x194] ss:$8 sps:$4 sm:$0xff]   ;;  %v3785_v25 = vld [vmem:[%s5322_s2 + $0x1a4] ss:$8 sps:$4 sm:$0xff]  }
  0x4e   : > { %v426_v5 = vor.u32 %v425_v61, %v422_v60  ;;  %v3183_v53 = vcombine.low %v4571_v48, %v4571_v48  ;;  %631 = vst [vmem:[#allocation2 + $0xe0] sm:$0xf0] %v627_v54  ;;  %v3783_v30 = vld [vmem:[%s5322_s2 + $0x1a0] ss:$8 sps:$4 sm:$0xff]   ;;  %v4705_v54 = vcombine.low %v4426_v32, %v4571_v48 }
  0x4f   : > { %2474 = vmatpush1.bf16.msra.mxu1 %v3729_v43  ;;  %v628_v43 = vrot.slane %v3170_v24, 5  ;;  %v3780_v24 = vld [vmem:[%s5322_s2 + $0x590] ss:$8 sps:$4 sm:$0xff]  }
  0x50   : > { %2686 = vmatpush1.bf16.msra.mxu0 %v3732_v44  ;;  %2475 = vmatprep.subr.bf16.mxu1 %v3737_v45  ;;  %v427_v26 = vrot.slane %v426_v5, 4  ;;  %v523_v44 = vrot.slane %v521_v37, 4  ;;  %v526_v45 = vrot.slane %v524_v38, 5  ;;  %625 = vst [vmem:[#allocation2 + $0xe0] sm:$0xf] %v3183_v53  ;;  %v4701_v53 = vcombine.high %v4426_v32, %v4571_v48  ;;  %613 = vst [vmem:[#allocation2 + $0xb0] sm:$0xff] %v4705_v54 }
  0x51   : > { %2687 = vmatprep.subr.bf16.mxu0 %v3740_v46  ;;  %v515_v46 = vrot.slane %v513_v39, 4  ;;  %632 = vst [vmem:[#allocation2 + $0xe8] sm:$0xf0] %v628_v43  ;;  %v3789_v37 = vld [vmem:[%s5322_s2 + $0x1b0] ss:$8 sps:$4 sm:$0xff]  }
  0x52   : > { %2461 = vmatmul.mubr.bf16.gmra.mrb[4].mxu1 %v4537_v11  ;;  %v3792_v38 = vld [vmem:[%s5322_s2 + $0x5b0] ss:$8 sps:$4 sm:$0xff]   ;;  %v3797_v39 = vld [vmem:[%s5322_s2 + $0x1c4] ss:$8 sps:$4 sm:$0xff]   ;;  %v3806_v43 = vld [vmem:[%s5322_s2 + $0x5d4] ss:$8 sps:$4 sm:$0xff]  }
  0x53   : > { %2476 = vmatpush1.bf16.msra.mxu1 %v3735_v47  ;;  %v518_v47 = vrot.slane %v516_v40, 5  ;;  %v3795_v40 = vld [vmem:[%s5322_s2 + $0x1c0] ss:$8 sps:$4 sm:$0xff]   ;;  %v3840_v32 = vld [vmem:[%s5322_s2 + $0x624] ss:$8 sps:$4 sm:$0xff]  }
  0x54   : > { %2688 = vmatpush1.bf16.msra.mxu0 %v3738_v50  ;;  %2477 = vmatprep.subr.bf16.mxu1 %v3743_v51  ;;  %v474_v50 = vsel %vm4375_vm4, %v469_v42, %v473_v31  ;;  %v349_v51 = vld [vmem:[%s4322_s30 + $0x8] sm:$0x11]  ;;  %v3803_v42 = vld [vmem:[%s5322_s2 + $0x1d4] ss:$8 sps:$4 sm:$0xff]   ;;  %s335_s30 = sadd.s32 %s3144_s24, %s3143_s23 }
  0x55   : > { %2689 = vmatprep.subr.bf16.mxu0 %v3746_v52  ;;  %v3184_v52 = vcombine.high %v4571_v48, %v4571_v48  ;;  %v3167_v60 = vcombine.low %v474_v50, %v474_v50  ;;  %v429_v61 = vshll.u32 %v349_v51, 16  ;;  %v3786_v31 = vld [vmem:[%s5322_s2 + $0x5a0] ss:$8 sps:$4 sm:$0xff]   ;;  %v3825_v48 = vld [vmem:[%s5322_s2 + $0x204] ss:$8 sps:$4 sm:$0xff]   ;;  %s3145_s25 = sshll.u32 %s335_s30, 3 }
  0x56   : > { %s337_s27 = scalar_lea.vmem %s5323_s3, %s3145_s25 }
  0x57   : > { %2478 = vmatpush1.bf16.msra.mxu1 %v3741_v56  ;;  %v3765_v56 = vld [vmem:[%s5322_s2 + $0x170] ss:$8 sps:$4 sm:$0xff]   ;;  %626 = vst [vmem:[#allocation2 + $0xe8] sm:$0xf] %v3184_v52  ;;  %505 = vst [vmem:[#allocation2 + $0xd0] sm:$0xf] %v3167_v60 }
  0x58   : > { %2690 = vmatpush1.bf16.msra.mxu0 %v3744_v57  ;;  %2479 = vmatprep.subr.bf16.mxu1 %v3749_v58  ;;  %v3768_v57 = vld [vmem:[%s5322_s2 + $0x570] ss:$8 sps:$4 sm:$0xff]   ;;  %v3168_v58 = vcombine.high %v474_v50, %v474_v50  ;;  %v431_v5 = vrot.slane %v429_v61, 5  ;;  %v3819_v52 = vld [vmem:[%s5322_s2 + $0x1f4] ss:$8 sps:$4 sm:$0xff]  }
  0x59   : > { %2691 = vmatprep.subr.bf16.mxu0 %v3752_v59  ;;  %v527_v59 = vor.u32 %v526_v45, %v523_v44  ;;  %v3801_v44 = vld [vmem:[%s5322_s2 + $0x1d0] ss:$8 sps:$4 sm:$0xff]   ;;  %v3823_v60 = vld [vmem:[%s5322_s2 + $0x200] ss:$8 sps:$4 sm:$0xff]  }
  0x5a   : > { %506 = vst [vmem:[#allocation2 + $0xd8] sm:$0xf] %v3168_v58  ;;  %v4611_v9 = vsel %vm4375_vm4, %v427_v26, %v431_v5  ;;  %v3788_v26 = vld [vmem:[%s5322_s2 + $0x5a4] ss:$8 sps:$4 sm:$0xff]   ;;  %v3804_v45 = vld [vmem:[%s5322_s2 + $0x5d0] ss:$8 sps:$4 sm:$0xff]  }
  0x5b   : > { %2480 = vmatpush1.bf16.msra.mxu1 %v3747_v62  ;;  %v3773_v62 = vld [vmem:[%s5322_s2 + $0x184] ss:$8 sps:$4 sm:$0xff]   ;;  %531 = vst [vmem:[#allocation2 + $0xd8] sm:$0xf0] %v527_v59  ;;  %v3161_v19 = vcombine.low %v4611_v9, %v4397_v20  ;;  %v3162_v21 = vcombine.high %v4611_v9, %v4397_v20  ;;  %v3820_v58 = vld [vmem:[%s5322_s2 + $0x5f0] ss:$8 sps:$4 sm:$0xff]  }
  0x5c   : > { %2692 = vmatpush1.bf16.msra.mxu0 %v3750_v63  ;;  %2481 = vmatprep.subr.bf16.mxu1 %v3755_v0  ;;  %v3776_v63 = vld [vmem:[%s5322_s2 + $0x584] ss:$8 sps:$4 sm:$0xff]   ;;  %v519_v0 = vor.u32 %v518_v47, %v515_v46  ;;  %v3826_v61 = vld [vmem:[%s5322_s2 + $0x600] ss:$8 sps:$4 sm:$0xff]   ;;  %v3834_v5 = vld [vmem:[%s5322_s2 + $0x614] ss:$8 sps:$4 sm:$0xff]  }
  0x5d   : > { %2693 = vmatprep.subr.bf16.mxu0 %v3758_v1  ;;  %v4593_v1 = vcombine.high %v4402_v23, %v474_v50  ;;  %2503 = vmatprep.mubr.bf16.mxu1 %v3162_v21  ;;  %v3810_v46 = vld [vmem:[%s5322_s2 + $0x1e4] ss:$8 sps:$4 sm:$0xff]   ;;  %v3832_v21 = vld [vmem:[%s5322_s2 + $0x610] ss:$8 sps:$4 sm:$0xff]   ;;  %v3838_v9 = vld [vmem:[%s5322_s2 + $0x620] ss:$8 sps:$4 sm:$0xff]  }
  0x5e   : > { %530 = vst [vmem:[#allocation2 + $0xd0] sm:$0xf0] %v519_v0  ;;  %v3814_v47 = vld [vmem:[%s5322_s2 + $0x5e4] ss:$8 sps:$4 sm:$0xff]   ;;  %v3153_v0 = vcombine.low %v4337_v49, %v4351_v55 }
  0x5f   : > { %2482 = vmatpush1.bf16.msra.mxu1 %v3753_v2  ;;  %v4596_v2 = vcombine.low %v4402_v23, %v474_v50  ;;  %v3771_v23 = vld [vmem:[%s5322_s2 + $0x180] ss:$8 sps:$4 sm:$0xff]   ;;  %v3828_v59 = vld [vmem:[%s5322_s2 + $0x604] ss:$8 sps:$4 sm:$0xff]  }
  0x60   : > { %2694 = vmatpush1.bf16.msra.mxu0 %v3756_v3  ;;  %2483 = vmatprep.subr.bf16.mxu1 %v3761_v6  ;;  %v581_v3 = vrot.slane %v349_v51, 5  ;;  %v3808_v50 = vld [vmem:[%s5322_s2 + $0x1e0] ss:$8 sps:$4 sm:$0xff]   ;;  %v3837_v20 = vld [vmem:[%s5322_s2 + $0x224] ss:$8 sps:$4 sm:$0xff]  }
  0x61   : > { %2695 = vmatprep.subr.bf16.mxu0 %v3764_v12  ;;  %493 = vst [vmem:[#allocation2 + $0xa0] sm:$0xff] %v4596_v2  ;;  %v3812_v51 = vld [vmem:[%s5322_s2 + $0x5e0] ss:$8 sps:$4 sm:$0xff]  }
  0x62   : > { %v4601_v6 = vsel %vm4387_vm5, %v3173_v35, %v581_v3  ;;  %v681_v27 = vld [vmem:[#allocation2 + $0xd8] sm:$0xff]  ;;  %v3156_v3 = vcombine.high %v4524_v4, %v4524_v4 }
  0x63   : > { %2484 = vmatpush1.bf16.msra.mxu1 %v3759_v22  ;;  %v3177_v12 = vcombine.low %v4601_v6, %v4416_v28  ;;  %v3178_v13 = vcombine.high %v4601_v6, %v4416_v28  ;;  %v3777_v22 = vld [vmem:[%s5322_s2 + $0x190] ss:$8 sps:$4 sm:$0xff]   ;;  %2672 = vmatprep.mubr.bf16.mxu0 %v681_v27  ;;  %v3791_v35 = vld [vmem:[%s5322_s2 + $0x1b4] ss:$8 sps:$4 sm:$0xff]   ;;  %v3849_v27 = vld [vmem:[%s5322_s2 + $0x244] ss:$8 sps:$4 sm:$0xff]  }
  0x64   : > { %2696 = vmatpush1.bf16.msra.mxu0 %v3762_v29  ;;  %2485 = vmatprep.subr.bf16.mxu1 %v3767_v36  ;;  %v3794_v36 = vld [vmem:[%s5322_s2 + $0x5b4] ss:$8 sps:$4 sm:$0xff]   ;;  %395 = vst [vmem:[#allocation2 + $0xc8] sm:$0xf] %v3156_v3  ;;  %v3889_v3 = vld [vmem:[%s5322_s2 + $0x2b0] ss:$8 sps:$4 sm:$0xff]  }
  0x65   : > { %2697 = vmatprep.subr.bf16.mxu0 %v3770_v41  ;;  %v680_v29 = vld [vmem:[#allocation2 + $0xd0] sm:$0xff]  ;;  %v3798_v41 = vld [vmem:[%s5322_s2 + $0x5c0] ss:$8 sps:$4 sm:$0xff]   ;;  %v3936_v28 = vld [vmem:[%s5322_s2 + $0x724] ss:$8 sps:$4 sm:$0xff]  }
  0x66   : > { %2673 = vmatmul.mubr.bf16.gmra.mrb[4].mxu0 %v680_v29  ;;  %v3847_v29 = vld [vmem:[%s5322_s2 + $0x240] ss:$8 sps:$4 sm:$0xff]  }
  0x67   : > { %2486 = vmatpush1.bf16.msra.mxu1 %v3765_v56  ;;  %2715 = vmatprep.mubr.bf16.mxu0 %v3182_v33  ;;  %v3800_v33 = vld [vmem:[%s5322_s2 + $0x5c4] ss:$8 sps:$4 sm:$0xff]   ;;  %v3822_v56 = vld [vmem:[%s5322_s2 + $0x5f4] ss:$8 sps:$4 sm:$0xff]   ;;  %v3934_v6 = vld [vmem:[%s5322_s2 + $0x720] ss:$8 sps:$4 sm:$0xff]  }
  0x68   : > { %2698 = vmatpush1.bf16.msra.mxu0 %v3768_v57  ;;  %2487 = vmatprep.subr.bf16.mxu1 %v3773_v62  ;;  %v3817_v57 = vld [vmem:[%s5322_s2 + $0x1f0] ss:$8 sps:$4 sm:$0xff]   ;;  %v3831_v62 = vld [vmem:[%s5322_s2 + $0x214] ss:$8 sps:$4 sm:$0xff]  }
  0x69   : > { %2699 = vmatprep.subr.bf16.mxu0 %v3776_v63  ;;  %v3154_v63 = vcombine.high %v4337_v49, %v4351_v55  ;;  %v4029_v55 = vld [vmem:[%s5322_s2 + $0x820] ss:$8 sps:$4 sm:$0xff]  }
  0x6b   : > { %2488 = vmatpush1.bf16.msra.mxu1 %v3771_v23  ;;  %v3158_v23 = vcombine.high %v4544_v14, %v4544_v14 }
  0x6c   : > { %2700 = vmatpush1.bf16.msra.mxu0 %v3774_v8  ;;  %2489 = vmatprep.subr.bf16.mxu1 %v3779_v15  ;;  %v3155_v8 = vcombine.low %v4524_v4, %v4524_v4  ;;  %v3157_v15 = vcombine.low %v4544_v14, %v4544_v14  ;;  %v3829_v4 = vld [vmem:[%s5322_s2 + $0x210] ss:$8 sps:$4 sm:$0xff]  }
  0x6d   : > { %2701 = vmatprep.subr.bf16.mxu0 %v3782_v18  ;;  %v683_v18 = vld [vmem:[#allocation2 + $0xe8] sm:$0xff]  ;;  %404 = vst [vmem:[#allocation2 + $0xc8] sm:$0xf0] %v3158_v23 }
  0x6e   : > { %394 = vst [vmem:[#allocation2 + $0xc0] sm:$0xf] %v3155_v8  ;;  %403 = vst [vmem:[#allocation2 + $0xc0] sm:$0xf0] %v3157_v15  ;;  %v3897_v23 = vld [vmem:[%s5322_s2 + $0x2c4] ss:$8 sps:$4 sm:$0xff]  }
  0x6f   : > { %2490 = vmatpush1.bf16.msra.mxu1 %v3777_v22  ;;  %v3843_v22 = vld [vmem:[%s5322_s2 + $0x234] ss:$8 sps:$4 sm:$0xff]  }
  0x70   : > { %2702 = vmatpush1.bf16.msra.mxu0 %v3780_v24  ;;  %2491 = vmatprep.subr.bf16.mxu1 %v3785_v25  ;;  %v3846_v24 = vld [vmem:[%s5322_s2 + $0x634] ss:$8 sps:$4 sm:$0xff]   ;;  %v3841_v25 = vld [vmem:[%s5322_s2 + $0x230] ss:$8 sps:$4 sm:$0xff]  }
  0x71   : > { %2703 = vmatprep.subr.bf16.mxu0 %v3788_v26  ;;  %v3844_v26 = vld [vmem:[%s5322_s2 + $0x630] ss:$8 sps:$4 sm:$0xff]  }
  0x72   : > { %v4891_v8 = vld [vmem:[%s4515_s13 + $0x10] sm:$0xff] }
  0x73   : > { %2492 = vmatpush1.bf16.msra.mxu1 %v3783_v30  ;;  %v3850_v30 = vld [vmem:[%s5322_s2 + $0x640] ss:$8 sps:$4 sm:$0xff]  }
  0x74   : > { %2704 = vmatpush1.bf16.msra.mxu0 %v3786_v31  ;;  %2493 = vmatprep.subr.bf16.mxu1 %v3791_v35  ;;  %v3855_v31 = vld [vmem:[%s5322_s2 + $0x254] ss:$8 sps:$4 sm:$0xff]   ;;  %v3856_v35 = vld [vmem:[%s5322_s2 + $0x650] ss:$8 sps:$4 sm:$0xff]  }
  0x75   : > { %2705 = vmatprep.subr.bf16.mxu0 %v3794_v36  ;;  %v3861_v36 = vld [vmem:[%s5322_s2 + $0x264] ss:$8 sps:$4 sm:$0xff]  }
  0x76   : > { %v678_v49 = vld [vmem:[#allocation2 + $0xc0] sm:$0xff] }
  0x77   : > { %2494 = vmatpush1.bf16.msra.mxu1 %v3789_v37  ;;  %v3864_v37 = vld [vmem:[%s5322_s2 + $0x664] ss:$8 sps:$4 sm:$0xff]  }
  0x78   : > { %2706 = vmatpush1.bf16.msra.mxu0 %v3792_v38  ;;  %2495 = vmatprep.subr.bf16.mxu1 %v3797_v39  ;;  %v3859_v38 = vld [vmem:[%s5322_s2 + $0x260] ss:$8 sps:$4 sm:$0xff]  }
  0x79   : > { %2707 = vmatprep.subr.bf16.mxu0 %v3800_v33  ;;  %v3862_v39 = vld [vmem:[%s5322_s2 + $0x660] ss:$8 sps:$4 sm:$0xff]   ;;  %v3867_v33 = vld [vmem:[%s5322_s2 + $0x274] ss:$8 sps:$4 sm:$0xff]  }
  0x7b   : > { %2496 = vmatpush1.bf16.msra.mxu1 %v3795_v40  ;;  %v3870_v40 = vld [vmem:[%s5322_s2 + $0x674] ss:$8 sps:$4 sm:$0xff]  }
  0x7c   : > { %2708 = vmatpush1.bf16.msra.mxu0 %v3798_v41  ;;  %2497 = vmatprep.subr.bf16.mxu1 %v3803_v42  ;;  %v3865_v41 = vld [vmem:[%s5322_s2 + $0x270] ss:$8 sps:$4 sm:$0xff]  }
  0x7d   : > { %2709 = vmatprep.subr.bf16.mxu0 %v3806_v43  ;;  %v3868_v42 = vld [vmem:[%s5322_s2 + $0x670] ss:$8 sps:$4 sm:$0xff]   ;;  %v3873_v43 = vld [vmem:[%s5322_s2 + $0x284] ss:$8 sps:$4 sm:$0xff]  }
  0x7f   : > { %2498 = vmatpush1.bf16.msra.mxu1 %v3801_v44  ;;  %v3876_v44 = vld [vmem:[%s5322_s2 + $0x684] ss:$8 sps:$4 sm:$0xff]  }
  0x80   : > { %2710 = vmatpush1.bf16.msra.mxu0 %v3804_v45  ;;  %2499 = vmatprep.subr.bf16.mxu1 %v3810_v46  ;;  %v3871_v45 = vld [vmem:[%s5322_s2 + $0x280] ss:$8 sps:$4 sm:$0xff]  }
  0x81   : > { %2711 = vmatprep.subr.bf16.mxu0 %v3814_v47  ;;  %v3874_v46 = vld [vmem:[%s5322_s2 + $0x680] ss:$8 sps:$4 sm:$0xff]   ;;  %v3879_v47 = vld [vmem:[%s5322_s2 + $0x294] ss:$8 sps:$4 sm:$0xff]  }
  0x83   : > { %2500 = vmatpush1.bf16.msra.mxu1 %v3808_v50  ;;  %v3882_v50 = vld [vmem:[%s5322_s2 + $0x694] ss:$8 sps:$4 sm:$0xff]  }
  0x84   : > { %2712 = vmatpush1.bf16.msra.mxu0 %v3812_v51  ;;  %2501 = vmatprep.subr.bf16.mxu1 %v3819_v52  ;;  %v3877_v51 = vld [vmem:[%s5322_s2 + $0x290] ss:$8 sps:$4 sm:$0xff]  }
  0x85   : > { %2713 = vmatprep.subr.bf16.mxu0 %v3822_v56  ;;  %v3880_v52 = vld [vmem:[%s5322_s2 + $0x690] ss:$8 sps:$4 sm:$0xff]   ;;  %v3885_v56 = vld [vmem:[%s5322_s2 + $0x2a4] ss:$8 sps:$4 sm:$0xff]  }
  0x87   : > { %2502 = vmatpush1.bf16.msra.mxu1 %v3817_v57  ;;  %v3888_v57 = vld [vmem:[%s5322_s2 + $0x6a4] ss:$8 sps:$4 sm:$0xff]  }
  0x88   : > { %2714 = vmatpush1.bf16.msra.mxu0 %v3820_v58  ;;  %2524 = vmatprep.subr.bf16.mxu1 %v3825_v48  ;;  %v3883_v58 = vld [vmem:[%s5322_s2 + $0x2a0] ss:$8 sps:$4 sm:$0xff]  }
  0x89   : > { %2736 = vmatprep.subr.bf16.mxu0 %v3828_v59  ;;  %v3886_v48 = vld [vmem:[%s5322_s2 + $0x6a0] ss:$8 sps:$4 sm:$0xff]   ;;  %v535_v59 = vshrl.u32 %v4544_v14, 16 }
  0x8a   : > { %2504 = vmatmul.mubr.bf16.vlgmr.msra.gmra.mrb[0].mxu1 %v3161_v19  ;;  %v682_v19 = vld [vmem:[#allocation2 + $0xe0] sm:$0xff] }
  0x8b   : > { %2716 = vmatmul.mubr.bf16.vlgmr.msra.gmra.mrb[0].mxu0 %v3181_v34  ;;  %2525 = vmatpush1.bf16.msra.mxu1 %v3823_v60  ;;  %v3835_v34 = vld [vmem:[%s5322_s2 + $0x220] ss:$8 sps:$4 sm:$0xff]   ;;  %v538_v60 = vshll.u32 %v4544_v14, 16  ;;  %v537_v15 = vrot.slane %v535_v59, 4 }
  0x8c   : > { %2737 = vmatpush1.bf16.msra.mxu0 %v3826_v61  ;;  %2526 = vmatprep.subr.bf16.mxu1 %v3831_v62  ;;  %v3891_v61 = vld [vmem:[%s5322_s2 + $0x2b4] ss:$8 sps:$4 sm:$0xff]   ;;  %v3919_v59 = vld [vmem:[%s5322_s2 + $0x300] ss:$8 sps:$4 sm:$0xff]  }
  0x8d   : > { %2738 = vmatprep.subr.bf16.mxu0 %v3834_v5  ;;  %2513 = vmatprep.mubr.bf16.mxu1 %v4593_v1  ;;  %v3894_v62 = vld [vmem:[%s5322_s2 + $0x6b4] ss:$8 sps:$4 sm:$0xff]   ;;  %v3892_v5 = vld [vmem:[%s5322_s2 + $0x6b0] ss:$8 sps:$4 sm:$0xff]  }
  0x8e   : > { %2725 = vmatprep.mubr.bf16.mxu0 %v683_v18  ;;  %v540_v18 = vrot.slane %v538_v60, 5  ;;  %v3922_v60 = vld [vmem:[%s5322_s2 + $0x700] ss:$8 sps:$4 sm:$0xff]  }
  0x8f   : > { %2527 = vmatpush1.bf16.msra.mxu1 %v3829_v4  ;;  %v3900_v4 = vld [vmem:[%s5322_s2 + $0x6c4] ss:$8 sps:$4 sm:$0xff]  }
  0x90   : > { %2739 = vmatpush1.bf16.msra.mxu0 %v3832_v21  ;;  %2528 = vmatprep.subr.bf16.mxu1 %v3837_v20  ;;  %v3160_v21 = vcombine.high %v4544_v14, %v4891_v8  ;;  %v3159_v20 = vcombine.low %v4544_v14, %v4891_v8 }
  0x91   : > { %2740 = vmatprep.subr.bf16.mxu0 %v3840_v32  ;;  %v549_v32 = vshrl.u32 %v4891_v8, 16 }
  0x92   : > { %2514 = vmatmul.mubr.bf16.gmra.mrb[4].mxu1 %v4596_v2  ;;  %v3852_v2 = vld [vmem:[%s5322_s2 + $0x644] ss:$8 sps:$4 sm:$0xff]  }
  0x93   : > { %2726 = vmatmul.mubr.bf16.gmra.mrb[4].mxu0 %v682_v19  ;;  %2529 = vmatpush1.bf16.msra.mxu1 %v3835_v34  ;;  %v552_v34 = vshll.u32 %v4891_v8, 16  ;;  %v3898_v19 = vld [vmem:[%s5322_s2 + $0x6c0] ss:$8 sps:$4 sm:$0xff]  }
  0x94   : > { %2741 = vmatpush1.bf16.msra.mxu0 %v3838_v9  ;;  %2530 = vmatprep.subr.bf16.mxu1 %v3843_v22  ;;  %v3895_v9 = vld [vmem:[%s5322_s2 + $0x2c0] ss:$8 sps:$4 sm:$0xff]   ;;  %v551_v22 = vrot.slane %v549_v32, 4  ;;  %v3940_v32 = vld [vmem:[%s5322_s2 + $0x730] ss:$8 sps:$4 sm:$0xff]  }
  0x95   : > { %2742 = vmatprep.subr.bf16.mxu0 %v3846_v24  ;;  %2556 = vmatprep.mubr.bf16.mxu1 %v3178_v13  ;;  %v3853_v13 = vld [vmem:[%s5322_s2 + $0x250] ss:$8 sps:$4 sm:$0xff]   ;;  %v3903_v24 = vld [vmem:[%s5322_s2 + $0x2d4] ss:$8 sps:$4 sm:$0xff]  }
  0x96   : > { %2768 = vmatprep.mubr.bf16.mxu0 %v4531_v7  ;;  %v3858_v7 = vld [vmem:[%s5322_s2 + $0x654] ss:$8 sps:$4 sm:$0xff]  }
  0x97   : > { %2531 = vmatpush1.bf16.msra.mxu1 %v3841_v25  ;;  %v541_v25 = vor.u32 %v540_v18, %v537_v15  ;;  %v3928_v15 = vld [vmem:[%s5322_s2 + $0x710] ss:$8 sps:$4 sm:$0xff]   ;;  %v3933_v18 = vld [vmem:[%s5322_s2 + $0x324] ss:$8 sps:$4 sm:$0xff]  }
  0x98   : > { %2743 = vmatpush1.bf16.msra.mxu0 %v3844_v26  ;;  %2532 = vmatprep.subr.bf16.mxu1 %v3849_v27  ;;  %v544_v26 = vshll.u32 %v4548_v16, 16  ;;  %v554_v27 = vrot.slane %v552_v34, 5  ;;  %v3951_v34 = vld [vmem:[%s5322_s2 + $0x354] ss:$8 sps:$4 sm:$0xff]  }
  0x99   : > { %2744 = vmatprep.subr.bf16.mxu0 %v3852_v2  ;;  %v3906_v2 = vld [vmem:[%s5322_s2 + $0x6d4] ss:$8 sps:$4 sm:$0xff]  }
  0x9b   : > { %2533 = vmatpush1.bf16.msra.mxu1 %v3847_v29  ;;  %v555_v29 = vor.u32 %v554_v27, %v551_v22  ;;  %v3960_v22 = vld [vmem:[%s5322_s2 + $0x764] ss:$8 sps:$4 sm:$0xff]   ;;  %v3966_v27 = vld [vmem:[%s5322_s2 + $0x774] ss:$8 sps:$4 sm:$0xff]  }
  0x9c   : > { %2745 = vmatpush1.bf16.msra.mxu0 %v3850_v30  ;;  %2534 = vmatprep.subr.bf16.mxu1 %v3855_v31  ;;  %v3901_v30 = vld [vmem:[%s5322_s2 + $0x2d0] ss:$8 sps:$4 sm:$0xff]  }
  0x9d   : > { %2746 = vmatprep.subr.bf16.mxu0 %v3858_v7  ;;  %v3904_v31 = vld [vmem:[%s5322_s2 + $0x6d0] ss:$8 sps:$4 sm:$0xff]   ;;  %v542_v7 = vrot.slane %v541_v25, 4  ;;  %v3958_v25 = vld [vmem:[%s5322_s2 + $0x760] ss:$8 sps:$4 sm:$0xff]  }
  0x9f   : > { %2535 = vmatpush1.bf16.msra.mxu1 %v3853_v13  ;;  %v546_v13 = vrot.slane %v544_v26, 5  ;;  %v3963_v26 = vld [vmem:[%s5322_s2 + $0x374] ss:$8 sps:$4 sm:$0xff]  }
  0xa0   : > { %2747 = vmatpush1.bf16.msra.mxu0 %v3856_v35  ;;  %2536 = vmatprep.subr.bf16.mxu1 %v3861_v36  ;;  %v3909_v35 = vld [vmem:[%s5322_s2 + $0x2e4] ss:$8 sps:$4 sm:$0xff]  }
  0xa1   : > { %2748 = vmatprep.subr.bf16.mxu0 %v3864_v37  ;;  %v3912_v36 = vld [vmem:[%s5322_s2 + $0x6e4] ss:$8 sps:$4 sm:$0xff]   ;;  %v359_v37 = vld [vmem:[%s4515_s13 + $0x18] sm:$0x11] }
  0xa3   : > { %2537 = vmatpush1.bf16.msra.mxu1 %v3859_v38  ;;  %v556_v38 = vrot.slane %v555_v29, 4  ;;  %v3964_v29 = vld [vmem:[%s5322_s2 + $0x770] ss:$8 sps:$4 sm:$0xff]  }
  0xa4   : > { %2749 = vmatpush1.bf16.msra.mxu0 %v3862_v39  ;;  %2538 = vmatprep.subr.bf16.mxu1 %v3867_v33  ;;  %v558_v39 = vshll.u32 %v359_v37, 16  ;;  %v3907_v33 = vld [vmem:[%s5322_s2 + $0x2e0] ss:$8 sps:$4 sm:$0xff]  }
  0xa5   : > { %2750 = vmatprep.subr.bf16.mxu0 %v3870_v40  ;;  %v3910_v40 = vld [vmem:[%s5322_s2 + $0x6e0] ss:$8 sps:$4 sm:$0xff]  }
  0xa7   : > { %2539 = vmatpush1.bf16.msra.mxu1 %v3865_v41  ;;  %v4936_v41 = vsel %vm4375_vm4, %v542_v7, %v546_v13  ;;  %v3967_v7 = vld [vmem:[%s5322_s2 + $0x380] ss:$8 sps:$4 sm:$0xff]  }
  0xa8   : > { %2751 = vmatpush1.bf16.msra.mxu0 %v3868_v42  ;;  %2540 = vmatprep.subr.bf16.mxu1 %v3873_v43  ;;  %v560_v42 = vrot.slane %v558_v39, 5  ;;  %v3915_v43 = vld [vmem:[%s5322_s2 + $0x2f4] ss:$8 sps:$4 sm:$0xff]   ;;  %v3970_v13 = vld [vmem:[%s5322_s2 + $0x780] ss:$8 sps:$4 sm:$0xff]  }
  0xa9   : > { %2752 = vmatprep.subr.bf16.mxu0 %v3876_v44  ;;  %v3918_v44 = vld [vmem:[%s5322_s2 + $0x6f4] ss:$8 sps:$4 sm:$0xff]   ;;  %v3981_v39 = vld [vmem:[%s5322_s2 + $0x3a4] ss:$8 sps:$4 sm:$0xff]  }
  0xab   : > { %2541 = vmatpush1.bf16.msra.mxu1 %v3871_v45  ;;  %v4946_v45 = vsel %vm4375_vm4, %v556_v38, %v560_v42  ;;  %v3976_v38 = vld [vmem:[%s5322_s2 + $0x790] ss:$8 sps:$4 sm:$0xff]   ;;  %v3982_v42 = vld [vmem:[%s5322_s2 + $0x7a0] ss:$8 sps:$4 sm:$0xff]  }
  0xac   : > { %2753 = vmatpush1.bf16.msra.mxu0 %v3874_v46  ;;  %2542 = vmatprep.subr.bf16.mxu1 %v3879_v47  ;;  %v3172_v46 = vcombine.high %v4936_v41, %v4946_v45  ;;  %v3171_v47 = vcombine.low %v4936_v41, %v4946_v45  ;;  %v4035_v41 = vld [vmem:[%s5322_s2 + $0x840] ss:$8 sps:$4 sm:$0xff]   ;;  %v4040_v45 = vld [vmem:[%s5322_s2 + $0x854] ss:$8 sps:$4 sm:$0xff]  }
  0xad   : > { %2754 = vmatprep.subr.bf16.mxu0 %v3882_v50  ;;  %v3913_v50 = vld [vmem:[%s5322_s2 + $0x2f0] ss:$8 sps:$4 sm:$0xff]  }
  0xaf   : > { %2543 = vmatpush1.bf16.msra.mxu1 %v3877_v51  ;;  %v3916_v51 = vld [vmem:[%s5322_s2 + $0x6f0] ss:$8 sps:$4 sm:$0xff]  }
  0xb0   : > { %2755 = vmatpush1.bf16.msra.mxu0 %v3880_v52  ;;  %2544 = vmatprep.subr.bf16.mxu1 %v3885_v56  ;;  %v3924_v52 = vld [vmem:[%s5322_s2 + $0x704] ss:$8 sps:$4 sm:$0xff]   ;;  %v3185_v56 = vrot.slane %v4544_v14, 9 }
  0xb1   : > { %2756 = vmatprep.subr.bf16.mxu0 %v3888_v57  ;;  %v638_v57 = vrot.slane %v4548_v16, 5  ;;  %v3927_v16 = vld [vmem:[%s5322_s2 + $0x314] ss:$8 sps:$4 sm:$0xff]   ;;  %v3948_v14 = vld [vmem:[%s5322_s2 + $0x744] ss:$8 sps:$4 sm:$0xff]  }
  0xb3   : > { %2545 = vmatpush1.bf16.msra.mxu1 %v3883_v58  ;;  %v3186_v58 = vrot.slane %v4891_v8, 9  ;;  %v3943_v8 = vld [vmem:[%s5322_s2 + $0x340] ss:$8 sps:$4 sm:$0xff]  }
  0xb4   : > { %2757 = vmatpush1.bf16.msra.mxu0 %v3886_v48  ;;  %2546 = vmatprep.subr.bf16.mxu1 %v3891_v61  ;;  %v642_v48 = vrot.slane %v359_v37, 5  ;;  %v4975_v61 = vsel %vm4387_vm5, %v3185_v56, %v638_v57  ;;  %v3973_v37 = vld [vmem:[%s5322_s2 + $0x390] ss:$8 sps:$4 sm:$0xff]   ;;  %v3991_v56 = vld [vmem:[%s5322_s2 + $0x3c0] ss:$8 sps:$4 sm:$0xff]  }
  0xb5   : > { %2758 = vmatprep.subr.bf16.mxu0 %v3894_v62  ;;  %v3930_v62 = vld [vmem:[%s5322_s2 + $0x714] ss:$8 sps:$4 sm:$0xff]   ;;  %v3994_v57 = vld [vmem:[%s5322_s2 + $0x7c0] ss:$8 sps:$4 sm:$0xff]  }
  0xb7   : > { %2547 = vmatpush1.bf16.msra.mxu1 %v3889_v3  ;;  %v4985_v3 = vsel %vm4387_vm5, %v3186_v58, %v642_v48  ;;  %v3999_v58 = vld [vmem:[%s5322_s2 + $0x3d4] ss:$8 sps:$4 sm:$0xff]  }
  0xb8   : > { %2759 = vmatpush1.bf16.msra.mxu0 %v3892_v5  ;;  %2548 = vmatprep.subr.bf16.mxu1 %v3897_v23  ;;  %v3187_v5 = vcombine.low %v4975_v61, %v4985_v3  ;;  %v3188_v23 = vcombine.high %v4975_v61, %v4985_v3  ;;  %v4002_v48 = vld [vmem:[%s5322_s2 + $0x7d4] ss:$8 sps:$4 sm:$0xff]  }
  0xb9   : > { %2760 = vmatprep.subr.bf16.mxu0 %v3900_v4  ;;  %v3942_v4 = vld [vmem:[%s5322_s2 + $0x734] ss:$8 sps:$4 sm:$0xff]  }
  0xbb   : > { %2549 = vmatpush1.bf16.msra.mxu1 %v3895_v9  ;;  %v3952_v9 = vld [vmem:[%s5322_s2 + $0x750] ss:$8 sps:$4 sm:$0xff]  }
  0xbc   : > { %2761 = vmatpush1.bf16.msra.mxu0 %v3898_v19  ;;  %2550 = vmatprep.subr.bf16.mxu1 %v3903_v24  ;;  %v3957_v19 = vld [vmem:[%s5322_s2 + $0x364] ss:$8 sps:$4 sm:$0xff]   ;;  %v3955_v24 = vld [vmem:[%s5322_s2 + $0x360] ss:$8 sps:$4 sm:$0xff]  }
  0xbd   : > { %2762 = vmatprep.subr.bf16.mxu0 %v3906_v2  ;;  %v3961_v2 = vld [vmem:[%s5322_s2 + $0x370] ss:$8 sps:$4 sm:$0xff]  }
  0xbf   : > { %2551 = vmatpush1.bf16.msra.mxu1 %v3901_v30  ;;  %v3969_v30 = vld [vmem:[%s5322_s2 + $0x384] ss:$8 sps:$4 sm:$0xff]  }
  0xc0   : > { %2763 = vmatpush1.bf16.msra.mxu0 %v3904_v31  ;;  %2552 = vmatprep.subr.bf16.mxu1 %v3909_v35  ;;  %v3972_v31 = vld [vmem:[%s5322_s2 + $0x784] ss:$8 sps:$4 sm:$0xff]   ;;  %v3975_v35 = vld [vmem:[%s5322_s2 + $0x394] ss:$8 sps:$4 sm:$0xff]  }
  0xc1   : > { %2764 = vmatprep.subr.bf16.mxu0 %v3912_v36  ;;  %v3978_v36 = vld [vmem:[%s5322_s2 + $0x794] ss:$8 sps:$4 sm:$0xff]  }
  0xc3   : > { %2553 = vmatpush1.bf16.msra.mxu1 %v3907_v33  ;;  %v3984_v33 = vld [vmem:[%s5322_s2 + $0x7a4] ss:$8 sps:$4 sm:$0xff]  }
  0xc4   : > { %2765 = vmatpush1.bf16.msra.mxu0 %v3910_v40  ;;  %2554 = vmatprep.subr.bf16.mxu1 %v3915_v43  ;;  %v3979_v40 = vld [vmem:[%s5322_s2 + $0x3a0] ss:$8 sps:$4 sm:$0xff]   ;;  %v3987_v43 = vld [vmem:[%s5322_s2 + $0x3b4] ss:$8 sps:$4 sm:$0xff]  }
  0xc5   : > { %2766 = vmatprep.subr.bf16.mxu0 %v3918_v44  ;;  %v3990_v44 = vld [vmem:[%s5322_s2 + $0x7b4] ss:$8 sps:$4 sm:$0xff]  }
  0xc7   : > { %2555 = vmatpush1.bf16.msra.mxu1 %v3913_v50  ;;  %v3985_v50 = vld [vmem:[%s5322_s2 + $0x3b0] ss:$8 sps:$4 sm:$0xff]  }
  0xc8   : > { %2767 = vmatpush1.bf16.msra.mxu0 %v3916_v51  ;;  %2577 = vmatprep.subr.bf16.mxu1 %v3921_v10  ;;  %v3988_v51 = vld [vmem:[%s5322_s2 + $0x7b0] ss:$8 sps:$4 sm:$0xff]   ;;  %v3993_v10 = vld [vmem:[%s5322_s2 + $0x3c4] ss:$8 sps:$4 sm:$0xff]  }
  0xc9   : > { %2789 = vmatprep.subr.bf16.mxu0 %v3924_v52  ;;  %v3996_v52 = vld [vmem:[%s5322_s2 + $0x7c4] ss:$8 sps:$4 sm:$0xff]  }
  0xca   : > { %2557 = vmatmul.mubr.bf16.vlgmr.msra.gmra.mrb[0].mxu1 %v3177_v12  ;;  %v3939_v12 = vld [vmem:[%s5322_s2 + $0x334] ss:$8 sps:$4 sm:$0xff]  }
  0xcb   : > { %2769 = vmatmul.mubr.bf16.vlgmr.msra.gmra.mrb[0].mxu0 %v4537_v11  ;;  %2578 = vmatpush1.bf16.msra.mxu1 %v3919_v59  ;;  %v3931_v11 = vld [vmem:[%s5322_s2 + $0x320] ss:$8 sps:$4 sm:$0xff]   ;;  %v3997_v59 = vld [vmem:[%s5322_s2 + $0x3d0] ss:$8 sps:$4 sm:$0xff]  }
  0xcc   : > { %2790 = vmatpush1.bf16.msra.mxu0 %v3922_v60  ;;  %2579 = vmatprep.subr.bf16.mxu1 %v3927_v16  ;;  %v4000_v60 = vld [vmem:[%s5322_s2 + $0x7d0] ss:$8 sps:$4 sm:$0xff]   ;;  %v4006_v16 = vld [vmem:[%s5322_s2 + $0x3e4] ss:$8 sps:$4 sm:$0xff]  }
  0xcd   : > { %2791 = vmatprep.subr.bf16.mxu0 %v3930_v62  ;;  %2566 = vmatprep.mubr.bf16.mxu1 %v4701_v53  ;;  %v4010_v62 = vld [vmem:[%s5322_s2 + $0x7e4] ss:$8 sps:$4 sm:$0xff]  }
  0xce   : > { %2778 = vmatprep.mubr.bf16.mxu0 %v3160_v21  ;;  %v3937_v21 = vld [vmem:[%s5322_s2 + $0x330] ss:$8 sps:$4 sm:$0xff]  }
  0xcf   : > { %2580 = vmatpush1.bf16.msra.mxu1 %v3925_v17  ;;  %v4004_v17 = vld [vmem:[%s5322_s2 + $0x3e0] ss:$8 sps:$4 sm:$0xff]  }
  0xd0   : > { %2792 = vmatpush1.bf16.msra.mxu0 %v3928_v15  ;;  %2581 = vmatprep.subr.bf16.mxu1 %v3933_v18  ;;  %v4008_v15 = vld [vmem:[%s5322_s2 + $0x7e0] ss:$8 sps:$4 sm:$0xff]   ;;  %v4013_v18 = vld [vmem:[%s5322_s2 + $0x3f4] ss:$8 sps:$4 sm:$0xff]  }
  0xd1   : > { %2793 = vmatprep.subr.bf16.mxu0 %v3936_v28  ;;  %v4016_v28 = vld [vmem:[%s5322_s2 + $0x7f4] ss:$8 sps:$4 sm:$0xff]  }
  0xd2   : > { %2567 = vmatmul.mubr.bf16.gmra.mrb[4].mxu1 %v4705_v54  ;;  %v3945_v54 = vld [vmem:[%s5322_s2 + $0x344] ss:$8 sps:$4 sm:$0xff]  }
  0xd3   : > { %2779 = vmatmul.mubr.bf16.gmra.mrb[4].mxu0 %v3159_v20  ;;  %2582 = vmatpush1.bf16.msra.mxu1 %v3931_v11  ;;  %v3946_v20 = vld [vmem:[%s5322_s2 + $0x740] ss:$8 sps:$4 sm:$0xff]   ;;  %v4011_v11 = vld [vmem:[%s5322_s2 + $0x3f0] ss:$8 sps:$4 sm:$0xff]  }
  0xd4   : > { %2794 = vmatpush1.bf16.msra.mxu0 %v3934_v6  ;;  %2583 = vmatprep.subr.bf16.mxu1 %v3939_v12  ;;  %v4014_v6 = vld [vmem:[%s5322_s2 + $0x7f0] ss:$8 sps:$4 sm:$0xff]   ;;  %v4021_v12 = vld [vmem:[%s5322_s2 + $0x804] ss:$8 sps:$4 sm:$0xff]  }
  0xd5   : > { %2795 = vmatprep.subr.bf16.mxu0 %v3942_v4  ;;  %2609 = vmatprep.mubr.bf16.mxu1 %v3154_v63  ;;  %v3949_v63 = vld [vmem:[%s5322_s2 + $0x350] ss:$8 sps:$4 sm:$0xff]   ;;  %v4019_v4 = vld [vmem:[%s5322_s2 + $0x800] ss:$8 sps:$4 sm:$0xff]  }
  0xd6   : > { %2821 = vmatprep.mubr.bf16.mxu0 %v4593_v1  ;;  %v3954_v1 = vld [vmem:[%s5322_s2 + $0x754] ss:$8 sps:$4 sm:$0xff]  }
  0xd7   : > { %2584 = vmatpush1.bf16.msra.mxu1 %v3937_v21  ;;  %v4024_v21 = vld [vmem:[%s5322_s2 + $0x814] ss:$8 sps:$4 sm:$0xff]  }
  0xd8   : > { %2796 = vmatpush1.bf16.msra.mxu0 %v3940_v32  ;;  %2585 = vmatprep.subr.bf16.mxu1 %v3945_v54  ;;  %v4071_v32 = vld [vmem:[#allocation2 + $0xa0] sm:$0xff]  ;;  %v679_v54 = vld [vmem:[#allocation2 + $0xc8] sm:$0xff] }
  0xd9   : > { %2797 = vmatprep.subr.bf16.mxu0 %v3948_v14  ;;  %v4022_v14 = vld [vmem:[%s5322_s2 + $0x810] ss:$8 sps:$4 sm:$0xff]  }
  0xdb   : > { %2586 = vmatpush1.bf16.msra.mxu1 %v3943_v8  ;;  %v4031_v8 = vld [vmem:[%s5322_s2 + $0x824] ss:$8 sps:$4 sm:$0xff]  }
  0xdc   : > { %2798 = vmatpush1.bf16.msra.mxu0 %v3946_v20  ;;  %2587 = vmatprep.subr.bf16.mxu1 %v3951_v34  ;;  %v4037_v20 = vld [vmem:[%s5322_s2 + $0x844] ss:$8 sps:$4 sm:$0xff]   ;;  %v4046_v34 = vld [vmem:[%s5322_s2 + $0x874] ss:$8 sps:$4 sm:$0xff]  }
  0xdd   : > { %2799 = vmatprep.subr.bf16.mxu0 %v3954_v1  ;;  %v4044_v1 = vld [vmem:[%s5322_s2 + $0x870] ss:$8 sps:$4 sm:$0xff]  }
  0xdf   : > { %2588 = vmatpush1.bf16.msra.mxu1 %v3949_v63  ;;  %v4049_v63 = vld [vmem:[%s5322_s2 + $0x884] ss:$8 sps:$4 sm:$0xff]  }
  0xe0   : > { %2800 = vmatpush1.bf16.msra.mxu0 %v3952_v9  ;;  %2589 = vmatprep.subr.bf16.mxu1 %v3957_v19  ;;  %v4047_v9 = vld [vmem:[%s5322_s2 + $0x880] ss:$8 sps:$4 sm:$0xff]   ;;  %v4052_v19 = vld [vmem:[%s5322_s2 + $0x894] ss:$8 sps:$4 sm:$0xff]  }
  0xe1   : > { %2801 = vmatprep.subr.bf16.mxu0 %v3960_v22  ;;  %v4050_v22 = vld [vmem:[%s5322_s2 + $0x890] ss:$8 sps:$4 sm:$0xff]  }
  0xe3   : > { %2590 = vmatpush1.bf16.msra.mxu1 %v3955_v24  ;;  %v4055_v24 = vld [vmem:[%s5322_s2 + $0x8a4] ss:$8 sps:$4 sm:$0xff]  }
  0xe4   : > { %2802 = vmatpush1.bf16.msra.mxu0 %v3958_v25  ;;  %2591 = vmatprep.subr.bf16.mxu1 %v3963_v26  ;;  %v4053_v25 = vld [vmem:[%s5322_s2 + $0x8a0] ss:$8 sps:$4 sm:$0xff]   ;;  %v4058_v26 = vld [vmem:[%s5322_s2 + $0x8b4] ss:$8 sps:$4 sm:$0xff]  }
  0xe5   : > { %2803 = vmatprep.subr.bf16.mxu0 %v3966_v27  ;;  %v4056_v27 = vld [vmem:[%s5322_s2 + $0x8b0] ss:$8 sps:$4 sm:$0xff]  }
  0xe7   : > { %2592 = vmatpush1.bf16.msra.mxu1 %v3961_v2  ;;  %v4061_v2 = vld [vmem:[%s5322_s2 + $0x8c4] ss:$8 sps:$4 sm:$0xff]  }
  0xe8   : > { %2804 = vmatpush1.bf16.msra.mxu0 %v3964_v29  ;;  %2593 = vmatprep.subr.bf16.mxu1 %v3969_v30  ;;  %v4059_v29 = vld [vmem:[%s5322_s2 + $0x8c0] ss:$8 sps:$4 sm:$0xff]   ;;  %v4064_v30 = vld [vmem:[%s5322_s2 + $0x8d4] ss:$8 sps:$4 sm:$0xff]  }
  0xe9   : > { %2805 = vmatprep.subr.bf16.mxu0 %v3972_v31  ;;  %v4062_v31 = vld [vmem:[%s5322_s2 + $0x8d0] ss:$8 sps:$4 sm:$0xff]  }
  0xeb   : > { %2594 = vmatpush1.bf16.msra.mxu1 %v3967_v7  ;;  %v4067_v7 = vld [vmem:[%s5322_s2 + $0x8e4] ss:$8 sps:$4 sm:$0xff]  }
  0xec   : > { %2806 = vmatpush1.bf16.msra.mxu0 %v3970_v13  ;;  %2595 = vmatprep.subr.bf16.mxu1 %v3975_v35  ;;  %v4065_v13 = vld [vmem:[%s5322_s2 + $0x8e0] ss:$8 sps:$4 sm:$0xff]   ;;  %v4070_v35 = vld [vmem:[%s5322_s2 + $0x8f4] ss:$8 sps:$4 sm:$0xff]  }
  0xed   : > { %2807 = vmatprep.subr.bf16.mxu0 %v3978_v36  ;;  %v4068_v36 = vld [vmem:[%s5322_s2 + $0x8f0] ss:$8 sps:$4 sm:$0xff]  }
  0xef   : > { %2596 = vmatpush1.bf16.msra.mxu1 %v3973_v37  ;;  %v4072_v37 = vld [vmem:[#allocation2 + $0xb0] sm:$0xff] }
  0xf0   : > { %2808 = vmatpush1.bf16.msra.mxu0 %v3976_v38  ;;  %2597 = vmatprep.subr.bf16.mxu1 %v3981_v39 }
  0xf1   : > { %2809 = vmatprep.subr.bf16.mxu0 %v3984_v33 }
  0xf3   : > { %2598 = vmatpush1.bf16.msra.mxu1 %v3979_v40 }
  0xf4   : > { %2810 = vmatpush1.bf16.msra.mxu0 %v3982_v42  ;;  %2599 = vmatprep.subr.bf16.mxu1 %v3987_v43 }
  0xf5   : > { %2811 = vmatprep.subr.bf16.mxu0 %v3990_v44 }
  0xf7   : > { %2600 = vmatpush1.bf16.msra.mxu1 %v3985_v50 }
  0xf8   : > { %2812 = vmatpush1.bf16.msra.mxu0 %v3988_v51  ;;  %2601 = vmatprep.subr.bf16.mxu1 %v3993_v10 }
  0xf9   : > { %2813 = vmatprep.subr.bf16.mxu0 %v3996_v52 }
  0xfb   : > { %2602 = vmatpush1.bf16.msra.mxu1 %v3991_v56 }
  0xfc   : > { %2814 = vmatpush1.bf16.msra.mxu0 %v3994_v57  ;;  %2603 = vmatprep.subr.bf16.mxu1 %v3999_v58 }
  0xfd   : > { %2815 = vmatprep.subr.bf16.mxu0 %v4002_v48 }
  0xff   : > { %2604 = vmatpush1.bf16.msra.mxu1 %v3997_v59 }
 0x100   : > { %2816 = vmatpush1.bf16.msra.mxu0 %v4000_v60  ;;  %2605 = vmatprep.subr.bf16.mxu1 %v4006_v16 }
 0x101   : > { %2817 = vmatprep.subr.bf16.mxu0 %v4010_v62 }
 0x103   : > { %2606 = vmatpush1.bf16.msra.mxu1 %v4004_v17 }
 0x104   : > { %2818 = vmatpush1.bf16.msra.mxu0 %v4008_v15  ;;  %2607 = vmatprep.subr.bf16.mxu1 %v4013_v18 }
 0x105   : > { %2819 = vmatprep.subr.bf16.mxu0 %v4016_v28 }
 0x107   : > { %2608 = vmatpush1.bf16.msra.mxu1 %v4011_v11 }
 0x108   : > { %2820 = vmatpush1.bf16.msra.mxu0 %v4014_v6  ;;  %3488 = vmatprep.subr.bf16.mxu1 %v4021_v12 }
 0x109   : > { %2842 = vmatprep.subr.bf16.mxu0 %v4021_v12 }
 0x10a   : > { %2610 = vmatmul.mubr.bf16.vlgmr.msra.gmra.mrb[0].mxu1 %v3153_v0  ;;  %v4034_v0 = vld [vmem:[%s5322_s2 + $0x834] ss:$8 sps:$4 sm:$0xff]  }
 0x10b   : > { %2822 = vmatmul.mubr.bf16.vlgmr.msra.gmra.mrb[0].mxu0 %v4071_v32  ;;  %3504 = vmatpush1.bf16.msra.mxu1 %v4019_v4 }
 0x10c   : > { %2843 = vmatpush1.bf16.msra.mxu0 %v4019_v4  ;;  %3489 = vmatprep.subr.bf16.mxu1 %v4024_v21 }
 0x10d   : > { %2844 = vmatprep.subr.bf16.mxu0 %v4024_v21  ;;  %2619 = vmatprep.mubr.bf16.mxu1 %v679_v54 }
 0x10e   : > { %2831 = vmatprep.mubr.bf16.mxu0 %v3172_v46  ;;  %v4032_v46 = vld [vmem:[%s5322_s2 + $0x830] ss:$8 sps:$4 sm:$0xff]  }
 0x10f   : > { %3505 = vmatpush1.bf16.msra.mxu1 %v4022_v14 }
 0x110   : > { %2845 = vmatpush1.bf16.msra.mxu0 %v4022_v14  ;;  %3490 = vmatprep.subr.bf16.mxu1 %v4031_v8 }
 0x111   : > { %2846 = vmatprep.subr.bf16.mxu0 %v4031_v8 }
 0x112   : > { %2620 = vmatmul.mubr.bf16.gmra.mrb[4].mxu1 %v678_v49 }
 0x113   : > { %2832 = vmatmul.mubr.bf16.gmra.mrb[4].mxu0 %v3171_v47  ;;  %3506 = vmatpush1.bf16.msra.mxu1 %v4029_v55  ;;  %v4043_v47 = vld [vmem:[%s5322_s2 + $0x864] ss:$8 sps:$4 sm:$0xff]  }
 0x114   : > { %2847 = vmatpush1.bf16.msra.mxu0 %v4029_v55  ;;  %3491 = vmatprep.subr.bf16.mxu1 %v4034_v0 }
 0x115   : > { %2848 = vmatprep.subr.bf16.mxu0 %v4034_v0  ;;  %2874 = vmatprep.mubr.bf16.mxu0 %v4701_v53  ;;  %v4038_v53 = vld [vmem:[%s5322_s2 + $0x850] ss:$8 sps:$4 sm:$0xff]  }
 0x116   : > { %2884 = vmatprep.mubr.bf16.mxu1 %v3188_v23  ;;  %v4041_v23 = vld [vmem:[%s5322_s2 + $0x860] ss:$8 sps:$4 sm:$0xff]  }
 0x117   : > { %3507 = vmatpush1.bf16.msra.mxu1 %v4032_v46 }
 0x118   : > { %2849 = vmatpush1.bf16.msra.mxu0 %v4032_v46  ;;  %3492 = vmatprep.subr.bf16.mxu1 %v4037_v20 }
 0x119   : > { %2850 = vmatprep.subr.bf16.mxu0 %v4037_v20 }
 0x11b   : > { %3508 = vmatpush1.bf16.msra.mxu1 %v4035_v41 }
 0x11c   : > { %2851 = vmatpush1.bf16.msra.mxu0 %v4035_v41  ;;  %3493 = vmatprep.subr.bf16.mxu1 %v4040_v45 }
 0x11d   : > { %2852 = vmatprep.subr.bf16.mxu0 %v4040_v45 }
 0x11f   : > { %3509 = vmatpush1.bf16.msra.mxu1 %v4038_v53 }
 0x120   : > { %2853 = vmatpush1.bf16.msra.mxu0 %v4038_v53  ;;  %3494 = vmatprep.subr.bf16.mxu1 %v4043_v47 }
 0x121   : > { %2854 = vmatprep.subr.bf16.mxu0 %v4043_v47 }
 0x123   : > { %3510 = vmatpush1.bf16.msra.mxu1 %v4041_v23 }
 0x124   : > { %2855 = vmatpush1.bf16.msra.mxu0 %v4041_v23  ;;  %3495 = vmatprep.subr.bf16.mxu1 %v4046_v34 }
 0x125   : > { %2856 = vmatprep.subr.bf16.mxu0 %v4046_v34 }
 0x127   : > { %3511 = vmatpush1.bf16.msra.mxu1 %v4044_v1 }
 0x128   : > { %2857 = vmatpush1.bf16.msra.mxu0 %v4044_v1  ;;  %3496 = vmatprep.subr.bf16.mxu1 %v4049_v63 }
 0x129   : > { %2858 = vmatprep.subr.bf16.mxu0 %v4049_v63 }
 0x12b   : > { %3512 = vmatpush1.bf16.msra.mxu1 %v4047_v9 }
 0x12c   : > { %2859 = vmatpush1.bf16.msra.mxu0 %v4047_v9  ;;  %3497 = vmatprep.subr.bf16.mxu1 %v4052_v19 }
 0x12d   : > { %2860 = vmatprep.subr.bf16.mxu0 %v4052_v19 }
 0x12f   : > { %3513 = vmatpush1.bf16.msra.mxu1 %v4050_v22 }
 0x130   : > { %2861 = vmatpush1.bf16.msra.mxu0 %v4050_v22  ;;  %3498 = vmatprep.subr.bf16.mxu1 %v4055_v24 }
 0x131   : > { %2862 = vmatprep.subr.bf16.mxu0 %v4055_v24 }
 0x133   : > { %3514 = vmatpush1.bf16.msra.mxu1 %v4053_v25 }
 0x134   : > { %2863 = vmatpush1.bf16.msra.mxu0 %v4053_v25  ;;  %3499 = vmatprep.subr.bf16.mxu1 %v4058_v26 }
 0x135   : > { %2864 = vmatprep.subr.bf16.mxu0 %v4058_v26 }
 0x137   : > { %3515 = vmatpush1.bf16.msra.mxu1 %v4056_v27 }
 0x138   : > { %2865 = vmatpush1.bf16.msra.mxu0 %v4056_v27  ;;  %3500 = vmatprep.subr.bf16.mxu1 %v4061_v2 }
 0x139   : > { %2866 = vmatprep.subr.bf16.mxu0 %v4061_v2 }
 0x13b   : > { %3516 = vmatpush1.bf16.msra.mxu1 %v4059_v29 }
 0x13c   : > { %2867 = vmatpush1.bf16.msra.mxu0 %v4059_v29  ;;  %3501 = vmatprep.subr.bf16.mxu1 %v4064_v30 }
 0x13d   : > { %2868 = vmatprep.subr.bf16.mxu0 %v4064_v30 }
 0x13f   : > { %3517 = vmatpush1.bf16.msra.mxu1 %v4062_v31 }
 0x140   : > { %2869 = vmatpush1.bf16.msra.mxu0 %v4062_v31  ;;  %3502 = vmatprep.subr.bf16.mxu1 %v4067_v7 }
 0x141   : > { %2870 = vmatprep.subr.bf16.mxu0 %v4067_v7 }
 0x143   : > { %3518 = vmatpush1.bf16.msra.mxu1 %v4065_v13 }
 0x144   : > { %2871 = vmatpush1.bf16.msra.mxu0 %v4065_v13  ;;  %3503 = vmatprep.subr.bf16.mxu1 %v4070_v35 }
 0x145   : > { %2872 = vmatprep.subr.bf16.mxu0 %v4070_v35 }
 0x147   : > { %3519 = vmatpush1.bf16.msra.mxu1 %v4068_v36 }
 0x148   : > { %2873 = vmatpush1.bf16.msra.mxu0 %v4068_v36 }
 0x14a   : > { %2885 = vmatmul.mubr.bf16.vlgmr.msra.gmra.mrb[8].mxu1 %v3187_v5 }
 0x14b   : > { %2875 = vmatmul.mubr.bf16.vlgmr.msra.gmra.mrb[0].mxu0 %v4072_v37 }
 0x1dd   : > { %v2611_v38 = vpop.f32.mrb[0].mxu1 }
 0x1de   : > { %v2613_v39 = vpop.f32.mrb[1].mxu1 }
 0x1df   : > { %v2615_v33 = vpop.f32.mrb[2].mxu1 }
 0x1e0   : > { %v2617_v40 = vpop.f32.mrb[3].mxu1 }
 0x1e5   : > { %v2621_v42 = vpop.f32.mrb[4].mxu1 }
 0x1e6   : > { %v2833_v43 = vpop.f32.mrb[4].mxu0  ;;  %v2623_v50 = vpop.f32.mrb[5].mxu1 }
 0x1e7   : > { %v3524_v44 = vadd.f32 %v2833_v43, %v2621_v42  ;;  %v2835_v51 = vpop.f32.mrb[5].mxu0  ;;  %v2625_v52 = vpop.f32.mrb[6].mxu1 }
 0x1e8   : > { %v3526_v10 = vadd.f32 %v2835_v51, %v2623_v50  ;;  %v2837_v56 = vpop.f32.mrb[6].mxu0  ;;  %v2627_v58 = vpop.f32.mrb[7].mxu1 }
 0x1e9   : > { %v3528_v57 = vadd.f32 %v2837_v56, %v2625_v52  ;;  %v2839_v48 = vpop.f32.mrb[7].mxu0 }
 0x1ea   : > { %v3530_v61 = vadd.f32 %v2839_v48, %v2627_v58 }
 0x21d   : > { %v2886_v5 = vpop.f32.mrb[8].mxu1 }
 0x21e   : > { %v2876_v3 = vpop.f32.mrb[0].mxu0  ;;  %v3525_v60 = vadd.f32 %v3524_v44, %v2886_v5  ;;  %v2888_v62 = vpop.f32.mrb[9].mxu1 }
 0x21f   : > { %v3520_v59 = vadd.f32 %v2876_v3, %v2611_v38  ;;  %v2878_v16 = vpop.f32.mrb[1].mxu0  ;;  %v3527_v15 = vadd.f32 %v3526_v10, %v2888_v62  ;;  %v2890_v28 = vpop.f32.mrb[10].mxu1 }
 0x220   : > { %v3521_v17 = vadd.f32 %v2878_v16, %v2613_v39  ;;  %v2880_v18 = vpop.f32.mrb[2].mxu0  ;;  %2899 = vst [vmem:[%s337_s27 + $0x20] sm:$0xff] %v3525_v60  ;;  %v3529_v6 = vadd.f32 %v3528_v57, %v2890_v28  ;;  %v2892_v4 = vpop.f32.mrb[11].mxu1  ;;  %v2925_v46 = vmul.f32 %v3525_v60, %v3525_v60 }
 0x221   : > { %2895 = vst [vmem:[%s337_s27] sm:$0xff] %v3520_v59  ;;  %v3522_v11 = vadd.f32 %v2880_v18, %v2615_v33  ;;  %v2882_v12 = vpop.f32.mrb[3].mxu0  ;;  %2900 = vst [vmem:[%s337_s27 + $0x28] sm:$0xff] %v3527_v15  ;;  %v3531_v32 = vadd.f32 %v3530_v61, %v2892_v4  ;;  %v2921_v54 = vmul.f32 %v3520_v59, %v3520_v59 }
 0x222   : > { %2896 = vst [vmem:[%s337_s27 + $0x8] sm:$0xff] %v3521_v17  ;;  %v3523_v21 = vadd.f32 %v2882_v12, %v2617_v40  ;;  %2901 = vst [vmem:[%s337_s27 + $0x30] sm:$0xff] %v3529_v6  ;;  %v2922_v49 = vmul.f32 %v3521_v17, %v3521_v17  ;;  %v2926_v45 = vmul.f32 %v3527_v15, %v3527_v15 }
 0x223   : > { %2897 = vst [vmem:[%s337_s27 + $0x10] sm:$0xff] %v3522_v11  ;;  %v2903_v14 = vadd.f32 %v3522_v11, %v3520_v59  ;;  %v2923_v8 = vmul.f32 %v3522_v11, %v3522_v11  ;;  %2902 = vst [vmem:[%s337_s27 + $0x38] sm:$0xff] %v3531_v32  ;;  %v2927_v34 = vmul.f32 %v3529_v6, %v3529_v6 }
 0x224   : > { %2898 = vst [vmem:[%s337_s27 + $0x18] sm:$0xff] %v3523_v21  ;;  %v2912_v55 = vadd.f32 %v3523_v21, %v3521_v17  ;;  %v2924_v0 = vmul.f32 %v3523_v21, %v3523_v21  ;;  %v2928_v9 = vmul.f32 %v3531_v32, %v3531_v32 }
 0x225   : > { %v2929_v20 = vadd.f32 %v2923_v8, %v2921_v54  ;;  %v2904_v41 = vadd.f32 %v3525_v60, %v2903_v14 }
 0x226   : > { %v2938_v53 = vadd.f32 %v2924_v0, %v2922_v49  ;;  %v2913_v47 = vadd.f32 %v3527_v15, %v2912_v55 }
 0x227   : > { %v2905_v23 = vadd.f32 %v3529_v6, %v2904_v41  ;;  %v2930_v1 = vadd.f32 %v2929_v20, %v2925_v46 }
 0x228   : > { %v2914_v63 = vadd.f32 %v3531_v32, %v2913_v47  ;;  %v2939_v19 = vadd.f32 %v2938_v53, %v2926_v45 }
 0x229   : > { %v2906_v22 = vrot.slane %v2905_v23, 4  ;;  %v2931_v24 = vadd.f32 %v2930_v1, %v2927_v34 }
 0x22a   : > { %v2915_v25 = vrot.slane %v2914_v63, 4  ;;  %v2940_v26 = vadd.f32 %v2939_v19, %v2928_v9 }
 0x22b   : > { %v2907_v27 = vadd.f32 %v2906_v22, %v2905_v23  ;;  %v2932_v2 = vrot.slane %v2931_v24, 4 }
 0x22c   : > { %v2916_v29 = vadd.f32 %v2915_v25, %v2914_v63  ;;  %v2941_v30 = vrot.slane %v2940_v26, 4 }
 0x22d   : > { %v2908_v31 = vrot.slane %v2907_v27, 2  ;;  %v2933_v7 = vadd.f32 %v2932_v2, %v2931_v24 }
 0x22e   : > { %v2917_v13 = vrot.slane %v2916_v29, 2  ;;  %v2942_v35 = vadd.f32 %v2941_v30, %v2940_v26 }
 0x22f   : > { %v2909_v36 = vadd.f32 %v2908_v31, %v2907_v27  ;;  %v2934_v37 = vrot.slane %v2933_v7, 2 }
 0x230   : > { %v2918_v38 = vadd.f32 %v2917_v13, %v2916_v29  ;;  %v2943_v39 = vrot.slane %v2942_v35, 2 }
 0x231   : > { %v2910_v33 = vrot.slane %v2909_v36, 1  ;;  %v2935_v40 = vadd.f32 %v2934_v37, %v2933_v7 }
 0x232   : > { %v2919_v42 = vrot.slane %v2918_v38, 1  ;;  %v2944_v43 = vadd.f32 %v2943_v39, %v2942_v35 }
 0x233   : > { %v2936_v44 = vrot.slane %v2935_v40, 1  ;;  %v2911_v51 = vadd.f32 %v2910_v33, %v2909_v36 }
 0x234   : > { %v2945_v50 = vrot.slane %v2944_v43, 1  ;;  %v2920_v52 = vadd.f32 %v2919_v42, %v2918_v38 }
 0x235   : > { %v2937_v10 = vadd.f32 %v2936_v44, %v2935_v40 }
 0x236   : > { %v2946_v56 = vadd.f32 %v2945_v50, %v2944_v43 }
 0x237   : > { %v2948_v57 = vsel %vm2947_vm6, %v2911_v51, %v2937_v10 }
 0x238   : > { %v2951_v58 = vsel %vm2950_vm7, %v2948_v57, 0.0  ;;  %v2949_v48 = vsel %vm2947_vm6, %v2920_v52, %v2946_v56 }
 0x239   : > { %2953 = vst [vmem:[%s347_s6] sm:$0xff] %v2951_v58  ;;  %v2952_v61 = vsel %vm2950_vm7, %v2949_v48, 0.0 }
 0x23a   : > { %2954 = vst [vmem:[%s347_s6 + $0x8] sm:$0xff] %v2952_v61 }
 0x23b PF: > { %s15_s19 = sadd.s32 1, %s4111_s19   ;;  %s5329_s15 = smov %s4103_s17 }
 0x23c   : > { %p12_p10 = scmp.ge.s32.totalorder %s15_s19, 6   ;;  %s5330_s16 = smov %s4107_s18 }
 0x23d   : > { %s5331_s17 = smov %s5334_s20  ;;  %s5332_s18 = smov %s5338_s21 }
 0x23e   :  { %14 = sbr.rel (!%p12_p10) target bundleno = 3 (0x3), region = 77 }

</bundles_post_ra>
